<compile_context>
chip_gen: v5e
topology: v5e:2x2
jax: 0.10.0
libtpu: 0.0.40
codegen_flags: <defaults>
</compile_context>

<pallas_src>
import functools
import math

import jax
import jax.numpy as jnp
from jax.experimental import pallas as pl
from jax.experimental.pallas import tpu as pltpu


def _cfe_kernel(scal_ref, tv_ref, tl_ref,
                wq_ref, bq_ref, wk_ref, bk_ref, wv_ref, bv_ref, wo_ref, bo_ref,
                w1_ref, b1_ref, w2_ref, b2_ref,
                o_ref, *, num_heads):
    f32 = jnp.float32
    bf16 = jnp.bfloat16

    t_v = tv_ref[...].astype(f32)            # [S, D]
    t_l = tl_ref[...].astype(f32)            # [S, D]

    def linear(x, w_ref, b_ref):
        # bf16 operands on the MXU (native on v6e/v7x), f32 accumulate.
        y = jnp.dot(x.astype(bf16), w_ref[...].astype(bf16),
                    preferred_element_type=f32)
        return y + b_ref[...].astype(f32)

    q = linear(t_v, wq_ref, bq_ref)          # [S, D]
    k = linear(t_l, wk_ref, bk_ref)
    v = linear(t_l, wv_ref, bv_ref)

    seq, dim = q.shape
    head_dim = dim // num_heads
    scale = 1.0 / math.sqrt(head_dim)

    # Multi-head cross-attention: static (unrolled) loop over heads. Each head
    # is a contiguous lane slice, so the PyTorch view/transpose becomes simple
    # static slicing + concatenation (no relayout of the [S, D] slab).
    z_heads = []
    for h in range(num_heads):
        lo = h * head_dim
        qh = q[:, lo:lo + head_dim].astype(bf16)     # [S, hd]
        kh = k[:, lo:lo + head_dim].astype(bf16)     # [S, hd]
        vh = v[:, lo:lo + head_dim].astype(bf16)     # [S, hd]

        s = jax.lax.dot_general(                      # Q @ K^T  -> [S, S]
            qh, kh, (((1,), (1,)), ((), ())),
            preferred_element_type=f32) * scale
        s = s - jnp.max(s, axis=-1, keepdims=True)    # numerically-safe softmax
        p = jnp.exp(s)
        p = p / jnp.sum(p, axis=-1, keepdims=True)

        zh = jnp.dot(p.astype(bf16), vh,              # A @ V    -> [S, hd]
                     preferred_element_type=f32)
        z_heads.append(zh)
    z = jnp.concatenate(z_heads, axis=-1)             # [S, D]

    z = linear(z, wo_ref, bo_ref)                     # W_o projection

    alpha = scal_ref[0]
    beta = scal_ref[1]
    gamma = scal_ref[2]
    delta = scal_ref[3]

    t_l_prime = alpha * z + beta * t_l                # first gated residual
    h1 = jnp.maximum(linear(t_l_prime, w1_ref, b1_ref), 0.0)   # FFN hidden
    ffn = linear(h1, w2_ref, b2_ref)
    out = gamma * t_l_prime + delta * ffn             # second gated residual

    o_ref[...] = out.astype(o_ref.dtype)


def cross_feature_enhancement(t_v, t_l, params):
    """t_v, t_l: [B, S, D] float32. params: see init_params()."""
    B, S, D = t_v.shape
    assert t_l.shape == (B, S, D)
    H = int(params["num_heads"])
    assert D % H == 0, "input_dim must be divisible by num_heads"
    # D should be a multiple of 128 for lane-dense stores / full MXU columns.

    kernel = functools.partial(_cfe_kernel, num_heads=H)

    # Activations: one batch row per grid step, pipelined HBM->VMEM.
    # (For large B one would widen the batch tile; S*D=1K elems here is tiny.)
    x_spec = pl.BlockSpec((None, S, D), lambda b: (b, 0, 0))
    # Weights / biases: whole array, same block every step -> resident in VMEM.
    def resident(a):
        return pl.BlockSpec(a.shape, lambda b: (0, 0))
    smem_spec = pl.BlockSpec(memory_space=pltpu.MemorySpace.SMEM)

    weight_names = ("wq", "bq", "wk", "bk", "wv", "bv", "wo", "bo",
                    "w1", "b1", "w2", "b2")
    in_specs = [smem_spec, x_spec, x_spec] + [resident(params[n])
                                              for n in weight_names]

    return pl.pallas_call(
        kernel,
        out_shape=jax.ShapeDtypeStruct((B, S, D), jnp.float32),
        grid=(B,),
        in_specs=in_specs,
        out_specs=pl.BlockSpec((None, S, D), lambda b: (b, 0, 0)),
        compiler_params=pltpu.CompilerParams(
            dimension_semantics=("parallel",),      # both TCs on v7x
            vmem_limit_bytes=32 * 1024 * 1024),     # safe on v5e/v6e/v7x
    )(params["scalars"], t_v, t_l,
      *[params[n] for n in weight_names])


def init_params(key, input_dim, num_heads=8):
    """Deterministic synthetic init (~nn.Linear uniform). Weights are [in, out]
    bf16 (halves weight DMA, native MXU operand); biases/scalars stay f32."""
    ks = jax.random.split(key, 12)

    def linear_init(kw, kb, fan_in, fan_out):
        bound = 1.0 / math.sqrt(fan_in)
        w = jax.random.uniform(kw, (fan_in, fan_out), jnp.float32, -bound, bound)
        b = jax.random.uniform(kb, (1, fan_out), jnp.float32, -bound, bound)
        return w.astype(jnp.bfloat16), b

    wq, bq = linear_init(ks[0], ks[1], input_dim, input_dim)
    wk, bk = linear_init(ks[2], ks[3], input_dim, input_dim)
    wv, bv = linear_init(ks[4], ks[5], input_dim, input_dim)
    wo, bo = linear_init(ks[6], ks[7], input_dim, input_dim)
    w1, b1 = linear_init(ks[8], ks[9], input_dim, 4 * input_dim)
    w2, b2 = linear_init(ks[10], ks[11], 4 * input_dim, input_dim)

    return {
        "num_heads": num_heads,
        "wq": wq, "bq": bq, "wk": wk, "bk": bk, "wv": wv, "bv": bv,
        "wo": wo, "bo": bo, "w1": w1, "b1": b1, "w2": w2, "b2": b2,
        # learnable gates alpha/beta/gamma/delta (module inits them to 1.0;
        # use distinct values so the test exercises the gating formula)
        "scalars": jnp.array([1.1, 0.9, 1.2, 0.8], jnp.float32),
    }


def _reference(t_v, t_l, p):
    """Pure-JAX f32 reference with the same (bf16-valued) weights."""
    def lin(x, w, b):
        return x @ w.astype(jnp.float32) + b

    q = lin(t_v, p["wq"], p["bq"])
    k = lin(t_l, p["wk"], p["bk"])
    v = lin(t_l, p["wv"], p["bv"])
    B, S, D = q.shape
    H = int(p["num_heads"])
    hd = D // H
    qh = q.reshape(B, S, H, hd).transpose(0, 2, 1, 3)
    kh = k.reshape(B, S, H, hd).transpose(0, 2, 1, 3)
    vh = v.reshape(B, S, H, hd).transpose(0, 2, 1, 3)
    a = jnp.einsum("bhqd,bhkd->bhqk", qh, kh) / jnp.sqrt(jnp.float32(hd))
    a = jax.nn.softmax(a, axis=-1)
    z = jnp.einsum("bhqk,bhkd->bhqd", a, vh).transpose(0, 2, 1, 3).reshape(B, S, D)
    z = lin(z, p["wo"], p["bo"])
    al, be, ga, de = p["scalars"]
    tlp = al * z + be * t_l
    ffn = lin(jnp.maximum(lin(tlp, p["w1"], p["b1"]), 0.0), p["w2"], p["b2"])
    return ga * tlp + de * ffn


if __name__ == "__main__":
    key = jax.random.PRNGKey(0)
    kv, kl, kp = jax.random.split(key, 3)

    # Small but lane-dense shapes: input_dim = 128 (one full lane tile),
    # 8 heads -> head_dim 16, seq = 8, batch = 2.
    batch, seq, input_dim, num_heads = 2, 8, 128, 8
    t_v = jax.random.normal(kv, (batch, seq, input_dim), jnp.float32)
    t_l = jax.random.normal(kl, (batch, seq, input_dim), jnp.float32)
    params = init_params(kp, input_dim, num_heads)

    out = cross_feature_enhancement(t_v, t_l, params)
    out = jax.block_until_ready(out)

    ref = _reference(t_v, t_l, params)
    assert out.shape == (batch, seq, input_dim)
    # bf16 MXU operands (f32 accumulate) vs f32 reference => ~1% worst-case
    err = float(jnp.max(jnp.abs(out - ref)))
    assert jnp.allclose(out, ref, atol=5e-2, rtol=5e-2), f"max abs err {err}"

    print("KERNEL_OK")
</pallas_src>

<mosaic_0001>
module attributes {stable_mosaic.version = 11 : i64} {
  func.func @_cfe_kernel(%arg0: i32, %arg1: memref<4xf32, #tpu.memory_space<smem>>, %arg2: memref<1x8x128xf32, #tpu.memory_space<vmem>>, %arg3: memref<1x8x128xf32, #tpu.memory_space<vmem>>, %arg4: memref<128x128xbf16, #tpu.memory_space<vmem>>, %arg5: memref<1x128xf32, #tpu.memory_space<vmem>>, %arg6: memref<128x128xbf16, #tpu.memory_space<vmem>>, %arg7: memref<1x128xf32, #tpu.memory_space<vmem>>, %arg8: memref<128x128xbf16, #tpu.memory_space<vmem>>, %arg9: memref<1x128xf32, #tpu.memory_space<vmem>>, %arg10: memref<128x128xbf16, #tpu.memory_space<vmem>>, %arg11: memref<1x128xf32, #tpu.memory_space<vmem>>, %arg12: memref<128x512xbf16, #tpu.memory_space<vmem>>, %arg13: memref<1x512xf32, #tpu.memory_space<vmem>>, %arg14: memref<512x128xbf16, #tpu.memory_space<vmem>>, %arg15: memref<1x128xf32, #tpu.memory_space<vmem>>, %arg16: memref<1x8x128xf32, #tpu.memory_space<vmem>>) attributes {dimension_semantics = [#tpu.dimension_semantics<parallel>], iteration_bounds = array<i64: 2>, scalar_prefetch = 0 : i64, scratch_operands = 0 : i64, tpu.core_type = #tpu.core_type<tc>, window_params = [{transform_indices = @transform_0, window_bounds = array<i64: 4>}, {transform_indices = @transform_1, window_bounds = array<i64: 1, 8, 128>}, {transform_indices = @transform_2, window_bounds = array<i64: 1, 8, 128>}, {pipeline_mode = #tpu.pipeline_mode<synchronous>, transform_indices = @transform_3, window_bounds = array<i64: 128, 128>}, {pipeline_mode = #tpu.pipeline_mode<synchronous>, transform_indices = @transform_4, window_bounds = array<i64: 1, 128>}, {pipeline_mode = #tpu.pipeline_mode<synchronous>, transform_indices = @transform_5, window_bounds = array<i64: 128, 128>}, {pipeline_mode = #tpu.pipeline_mode<synchronous>, transform_indices = @transform_6, window_bounds = array<i64: 1, 128>}, {pipeline_mode = #tpu.pipeline_mode<synchronous>, transform_indices = @transform_7, window_bounds = array<i64: 128, 128>}, {pipeline_mode = #tpu.pipeline_mode<synchronous>, transform_indices = @transform_8, window_bounds = array<i64: 1, 128>}, {pipeline_mode = #tpu.pipeline_mode<synchronous>, transform_indices = @transform_9, window_bounds = array<i64: 128, 128>}, {pipeline_mode = #tpu.pipeline_mode<synchronous>, transform_indices = @transform_10, window_bounds = array<i64: 1, 128>}, {pipeline_mode = #tpu.pipeline_mode<synchronous>, transform_indices = @transform_11, window_bounds = array<i64: 128, 512>}, {pipeline_mode = #tpu.pipeline_mode<synchronous>, transform_indices = @transform_12, window_bounds = array<i64: 1, 512>}, {pipeline_mode = #tpu.pipeline_mode<synchronous>, transform_indices = @transform_13, window_bounds = array<i64: 512, 128>}, {pipeline_mode = #tpu.pipeline_mode<synchronous>, transform_indices = @transform_14, window_bounds = array<i64: 1, 128>}, {transform_indices = @transform_15, window_bounds = array<i64: 1, 8, 128>}]} {
    %c0 = arith.constant 0 : index
    %c0_0 = arith.constant 0 : index
    %c0_1 = arith.constant 0 : index
    %0 = vector.load %arg2[%c0, %c0_0, %c0_1] : memref<1x8x128xf32, #tpu.memory_space<vmem>>, vector<1x8x128xf32>
    %1 = vector.shape_cast %0 : vector<1x8x128xf32> to vector<8x128xf32>
    %c0_2 = arith.constant 0 : index
    %c0_3 = arith.constant 0 : index
    %c0_4 = arith.constant 0 : index
    %2 = vector.load %arg3[%c0_2, %c0_3, %c0_4] : memref<1x8x128xf32, #tpu.memory_space<vmem>>, vector<1x8x128xf32>
    %3 = vector.shape_cast %2 : vector<1x8x128xf32> to vector<8x128xf32>
    %4 = arith.truncf %1 : vector<8x128xf32> to vector<8x128xbf16>
    %c0_5 = arith.constant 0 : index
    %c0_6 = arith.constant 0 : index
    %5 = vector.load %arg4[%c0_5, %c0_6] : memref<128x128xbf16, #tpu.memory_space<vmem>>, vector<128x128xbf16>
    %cst = arith.constant dense<0.000000e+00> : vector<8x128xf32>
    %6 = tpu.matmul %4, %5, %cst {dimension_numbers = #tpu.dot_dimension_numbers<[1], [0], [0], [1], [0, 0, 1, 1], [], []>} : vector<8x128xbf16>, vector<128x128xbf16>, vector<8x128xf32> -> vector<8x128xf32>
    %c0_7 = arith.constant 0 : index
    %c0_8 = arith.constant 0 : index
    %7 = vector.load %arg5[%c0_7, %c0_8] : memref<1x128xf32, #tpu.memory_space<vmem>>, vector<1x128xf32>
    %8 = vector.broadcast %7 : vector<1x128xf32> to vector<8x128xf32>
    %9 = arith.addf %6, %8 : vector<8x128xf32>
    %10 = arith.truncf %3 : vector<8x128xf32> to vector<8x128xbf16>
    %c0_9 = arith.constant 0 : index
    %c0_10 = arith.constant 0 : index
    %11 = vector.load %arg6[%c0_9, %c0_10] : memref<128x128xbf16, #tpu.memory_space<vmem>>, vector<128x128xbf16>
    %cst_11 = arith.constant dense<0.000000e+00> : vector<8x128xf32>
    %12 = tpu.matmul %10, %11, %cst_11 {dimension_numbers = #tpu.dot_dimension_numbers<[1], [0], [0], [1], [0, 0, 1, 1], [], []>} : vector<8x128xbf16>, vector<128x128xbf16>, vector<8x128xf32> -> vector<8x128xf32>
    %c0_12 = arith.constant 0 : index
    %c0_13 = arith.constant 0 : index
    %13 = vector.load %arg7[%c0_12, %c0_13] : memref<1x128xf32, #tpu.memory_space<vmem>>, vector<1x128xf32>
    %14 = vector.broadcast %13 : vector<1x128xf32> to vector<8x128xf32>
    %15 = arith.addf %12, %14 : vector<8x128xf32>
    %16 = arith.truncf %3 : vector<8x128xf32> to vector<8x128xbf16>
    %c0_14 = arith.constant 0 : index
    %c0_15 = arith.constant 0 : index
    %17 = vector.load %arg8[%c0_14, %c0_15] : memref<128x128xbf16, #tpu.memory_space<vmem>>, vector<128x128xbf16>
    %cst_16 = arith.constant dense<0.000000e+00> : vector<8x128xf32>
    %18 = tpu.matmul %16, %17, %cst_16 {dimension_numbers = #tpu.dot_dimension_numbers<[1], [0], [0], [1], [0, 0, 1, 1], [], []>} : vector<8x128xbf16>, vector<128x128xbf16>, vector<8x128xf32> -> vector<8x128xf32>
    %c0_17 = arith.constant 0 : index
    %c0_18 = arith.constant 0 : index
    %19 = vector.load %arg9[%c0_17, %c0_18] : memref<1x128xf32, #tpu.memory_space<vmem>>, vector<1x128xf32>
    %20 = vector.broadcast %19 : vector<1x128xf32> to vector<8x128xf32>
    %21 = arith.addf %18, %20 : vector<8x128xf32>
    %22 = vector.extract_strided_slice %9 {offsets = [0, 0], sizes = [8, 16], strides = [1, 1]} : vector<8x128xf32> to vector<8x16xf32>
    %23 = arith.truncf %22 : vector<8x16xf32> to vector<8x16xbf16>
    %24 = vector.extract_strided_slice %15 {offsets = [0, 0], sizes = [8, 16], strides = [1, 1]} : vector<8x128xf32> to vector<8x16xf32>
    %25 = arith.truncf %24 : vector<8x16xf32> to vector<8x16xbf16>
    %26 = vector.extract_strided_slice %21 {offsets = [0, 0], sizes = [8, 16], strides = [1, 1]} : vector<8x128xf32> to vector<8x16xf32>
    %27 = arith.truncf %26 : vector<8x16xf32> to vector<8x16xbf16>
    %cst_19 = arith.constant dense<0.000000e+00> : vector<8x8xf32>
    %28 = tpu.matmul %23, %25, %cst_19 {dimension_numbers = #tpu.dot_dimension_numbers<[1], [1], [0], [0], [0, 0, 1, 0], [], []>} : vector<8x16xbf16>, vector<8x16xbf16>, vector<8x8xf32> -> vector<8x8xf32>
    %cst_20 = arith.constant 2.500000e-01 : f32
    %29 = vector.broadcast %cst_20 : f32 to vector<8x8xf32>
    %30 = arith.mulf %28, %29 : vector<8x8xf32>
    %cst_21 = arith.constant dense<0xFF800000> : vector<8xf32>
    %31 = vector.multi_reduction <maximumf>, %30, %cst_21 [1] : vector<8x8xf32> to vector<8xf32>
    %32 = vector.shape_cast %31 : vector<8xf32> to vector<8x1xf32>
    %33 = vector.broadcast %32 : vector<8x1xf32> to vector<8x8xf32>
    %34 = arith.subf %30, %33 : vector<8x8xf32>
    %35 = math.exp %34 : vector<8x8xf32>
    %cst_22 = arith.constant dense<0.000000e+00> : vector<8xf32>
    %36 = vector.multi_reduction <add>, %35, %cst_22 [1] : vector<8x8xf32> to vector<8xf32>
    %37 = vector.shape_cast %36 : vector<8xf32> to vector<8x1xf32>
    %38 = vector.broadcast %37 : vector<8x1xf32> to vector<8x8xf32>
    %39 = arith.divf %35, %38 : vector<8x8xf32>
    %40 = arith.truncf %39 : vector<8x8xf32> to vector<8x8xbf16>
    %cst_23 = arith.constant dense<0.000000e+00> : vector<8x16xf32>
    %41 = tpu.matmul %40, %27, %cst_23 {dimension_numbers = #tpu.dot_dimension_numbers<[1], [0], [0], [1], [0, 0, 1, 1], [], []>} : vector<8x8xbf16>, vector<8x16xbf16>, vector<8x16xf32> -> vector<8x16xf32>
    %42 = vector.extract_strided_slice %9 {offsets = [0, 16], sizes = [8, 16], strides = [1, 1]} : vector<8x128xf32> to vector<8x16xf32>
    %43 = arith.truncf %42 : vector<8x16xf32> to vector<8x16xbf16>
    %44 = vector.extract_strided_slice %15 {offsets = [0, 16], sizes = [8, 16], strides = [1, 1]} : vector<8x128xf32> to vector<8x16xf32>
    %45 = arith.truncf %44 : vector<8x16xf32> to vector<8x16xbf16>
    %46 = vector.extract_strided_slice %21 {offsets = [0, 16], sizes = [8, 16], strides = [1, 1]} : vector<8x128xf32> to vector<8x16xf32>
    %47 = arith.truncf %46 : vector<8x16xf32> to vector<8x16xbf16>
    %cst_24 = arith.constant dense<0.000000e+00> : vector<8x8xf32>
    %48 = tpu.matmul %43, %45, %cst_24 {dimension_numbers = #tpu.dot_dimension_numbers<[1], [1], [0], [0], [0, 0, 1, 0], [], []>} : vector<8x16xbf16>, vector<8x16xbf16>, vector<8x8xf32> -> vector<8x8xf32>
    %cst_25 = arith.constant 2.500000e-01 : f32
    %49 = vector.broadcast %cst_25 : f32 to vector<8x8xf32>
    %50 = arith.mulf %48, %49 : vector<8x8xf32>
    %cst_26 = arith.constant dense<0xFF800000> : vector<8xf32>
    %51 = vector.multi_reduction <maximumf>, %50, %cst_26 [1] : vector<8x8xf32> to vector<8xf32>
    %52 = vector.shape_cast %51 : vector<8xf32> to vector<8x1xf32>
    %53 = vector.broadcast %52 : vector<8x1xf32> to vector<8x8xf32>
    %54 = arith.subf %50, %53 : vector<8x8xf32>
    %55 = math.exp %54 : vector<8x8xf32>
    %cst_27 = arith.constant dense<0.000000e+00> : vector<8xf32>
    %56 = vector.multi_reduction <add>, %55, %cst_27 [1] : vector<8x8xf32> to vector<8xf32>
    %57 = vector.shape_cast %56 : vector<8xf32> to vector<8x1xf32>
    %58 = vector.broadcast %57 : vector<8x1xf32> to vector<8x8xf32>
    %59 = arith.divf %55, %58 : vector<8x8xf32>
    %60 = arith.truncf %59 : vector<8x8xf32> to vector<8x8xbf16>
    %cst_28 = arith.constant dense<0.000000e+00> : vector<8x16xf32>
    %61 = tpu.matmul %60, %47, %cst_28 {dimension_numbers = #tpu.dot_dimension_numbers<[1], [0], [0], [1], [0, 0, 1, 1], [], []>} : vector<8x8xbf16>, vector<8x16xbf16>, vector<8x16xf32> -> vector<8x16xf32>
    %62 = vector.extract_strided_slice %9 {offsets = [0, 32], sizes = [8, 16], strides = [1, 1]} : vector<8x128xf32> to vector<8x16xf32>
    %63 = arith.truncf %62 : vector<8x16xf32> to vector<8x16xbf16>
    %64 = vector.extract_strided_slice %15 {offsets = [0, 32], sizes = [8, 16], strides = [1, 1]} : vector<8x128xf32> to vector<8x16xf32>
    %65 = arith.truncf %64 : vector<8x16xf32> to vector<8x16xbf16>
    %66 = vector.extract_strided_slice %21 {offsets = [0, 32], sizes = [8, 16], strides = [1, 1]} : vector<8x128xf32> to vector<8x16xf32>
    %67 = arith.truncf %66 : vector<8x16xf32> to vector<8x16xbf16>
    %cst_29 = arith.constant dense<0.000000e+00> : vector<8x8xf32>
    %68 = tpu.matmul %63, %65, %cst_29 {dimension_numbers = #tpu.dot_dimension_numbers<[1], [1], [0], [0], [0, 0, 1, 0], [], []>} : vector<8x16xbf16>, vector<8x16xbf16>, vector<8x8xf32> -> vector<8x8xf32>
    %cst_30 = arith.constant 2.500000e-01 : f32
    %69 = vector.broadcast %cst_30 : f32 to vector<8x8xf32>
    %70 = arith.mulf %68, %69 : vector<8x8xf32>
    %cst_31 = arith.constant dense<0xFF800000> : vector<8xf32>
    %71 = vector.multi_reduction <maximumf>, %70, %cst_31 [1] : vector<8x8xf32> to vector<8xf32>
    %72 = vector.shape_cast %71 : vector<8xf32> to vector<8x1xf32>
    %73 = vector.broadcast %72 : vector<8x1xf32> to vector<8x8xf32>
    %74 = arith.subf %70, %73 : vector<8x8xf32>
    %75 = math.exp %74 : vector<8x8xf32>
    %cst_32 = arith.constant dense<0.000000e+00> : vector<8xf32>
    %76 = vector.multi_reduction <add>, %75, %cst_32 [1] : vector<8x8xf32> to vector<8xf32>
    %77 = vector.shape_cast %76 : vector<8xf32> to vector<8x1xf32>
    %78 = vector.broadcast %77 : vector<8x1xf32> to vector<8x8xf32>
    %79 = arith.divf %75, %78 : vector<8x8xf32>
    %80 = arith.truncf %79 : vector<8x8xf32> to vector<8x8xbf16>
    %cst_33 = arith.constant dense<0.000000e+00> : vector<8x16xf32>
    %81 = tpu.matmul %80, %67, %cst_33 {dimension_numbers = #tpu.dot_dimension_numbers<[1], [0], [0], [1], [0, 0, 1, 1], [], []>} : vector<8x8xbf16>, vector<8x16xbf16>, vector<8x16xf32> -> vector<8x16xf32>
    %82 = vector.extract_strided_slice %9 {offsets = [0, 48], sizes = [8, 16], strides = [1, 1]} : vector<8x128xf32> to vector<8x16xf32>
    %83 = arith.truncf %82 : vector<8x16xf32> to vector<8x16xbf16>
    %84 = vector.extract_strided_slice %15 {offsets = [0, 48], sizes = [8, 16], strides = [1, 1]} : vector<8x128xf32> to vector<8x16xf32>
    %85 = arith.truncf %84 : vector<8x16xf32> to vector<8x16xbf16>
    %86 = vector.extract_strided_slice %21 {offsets = [0, 48], sizes = [8, 16], strides = [1, 1]} : vector<8x128xf32> to vector<8x16xf32>
    %87 = arith.truncf %86 : vector<8x16xf32> to vector<8x16xbf16>
    %cst_34 = arith.constant dense<0.000000e+00> : vector<8x8xf32>
    %88 = tpu.matmul %83, %85, %cst_34 {dimension_numbers = #tpu.dot_dimension_numbers<[1], [1], [0], [0], [0, 0, 1, 0], [], []>} : vector<8x16xbf16>, vector<8x16xbf16>, vector<8x8xf32> -> vector<8x8xf32>
    %cst_35 = arith.constant 2.500000e-01 : f32
    %89 = vector.broadcast %cst_35 : f32 to vector<8x8xf32>
    %90 = arith.mulf %88, %89 : vector<8x8xf32>
    %cst_36 = arith.constant dense<0xFF800000> : vector<8xf32>
    %91 = vector.multi_reduction <maximumf>, %90, %cst_36 [1] : vector<8x8xf32> to vector<8xf32>
    %92 = vector.shape_cast %91 : vector<8xf32> to vector<8x1xf32>
    %93 = vector.broadcast %92 : vector<8x1xf32> to vector<8x8xf32>
    %94 = arith.subf %90, %93 : vector<8x8xf32>
    %95 = math.exp %94 : vector<8x8xf32>
    %cst_37 = arith.constant dense<0.000000e+00> : vector<8xf32>
    %96 = vector.multi_reduction <add>, %95, %cst_37 [1] : vector<8x8xf32> to vector<8xf32>
    %97 = vector.shape_cast %96 : vector<8xf32> to vector<8x1xf32>
    %98 = vector.broadcast %97 : vector<8x1xf32> to vector<8x8xf32>
    %99 = arith.divf %95, %98 : vector<8x8xf32>
    %100 = arith.truncf %99 : vector<8x8xf32> to vector<8x8xbf16>
    %cst_38 = arith.constant dense<0.000000e+00> : vector<8x16xf32>
    %101 = tpu.matmul %100, %87, %cst_38 {dimension_numbers = #tpu.dot_dimension_numbers<[1], [0], [0], [1], [0, 0, 1, 1], [], []>} : vector<8x8xbf16>, vector<8x16xbf16>, vector<8x16xf32> -> vector<8x16xf32>
    %102 = vector.extract_strided_slice %9 {offsets = [0, 64], sizes = [8, 16], strides = [1, 1]} : vector<8x128xf32> to vector<8x16xf32>
    %103 = arith.truncf %102 : vector<8x16xf32> to vector<8x16xbf16>
    %104 = vector.extract_strided_slice %15 {offsets = [0, 64], sizes = [8, 16], strides = [1, 1]} : vector<8x128xf32> to vector<8x16xf32>
    %105 = arith.truncf %104 : vector<8x16xf32> to vector<8x16xbf16>
    %106 = vector.extract_strided_slice %21 {offsets = [0, 64], sizes = [8, 16], strides = [1, 1]} : vector<8x128xf32> to vector<8x16xf32>
    %107 = arith.truncf %106 : vector<8x16xf32> to vector<8x16xbf16>
    %cst_39 = arith.constant dense<0.000000e+00> : vector<8x8xf32>
    %108 = tpu.matmul %103, %105, %cst_39 {dimension_numbers = #tpu.dot_dimension_numbers<[1], [1], [0], [0], [0, 0, 1, 0], [], []>} : vector<8x16xbf16>, vector<8x16xbf16>, vector<8x8xf32> -> vector<8x8xf32>
    %cst_40 = arith.constant 2.500000e-01 : f32
    %109 = vector.broadcast %cst_40 : f32 to vector<8x8xf32>
    %110 = arith.mulf %108, %109 : vector<8x8xf32>
    %cst_41 = arith.constant dense<0xFF800000> : vector<8xf32>
    %111 = vector.multi_reduction <maximumf>, %110, %cst_41 [1] : vector<8x8xf32> to vector<8xf32>
    %112 = vector.shape_cast %111 : vector<8xf32> to vector<8x1xf32>
    %113 = vector.broadcast %112 : vector<8x1xf32> to vector<8x8xf32>
    %114 = arith.subf %110, %113 : vector<8x8xf32>
    %115 = math.exp %114 : vector<8x8xf32>
    %cst_42 = arith.constant dense<0.000000e+00> : vector<8xf32>
    %116 = vector.multi_reduction <add>, %115, %cst_42 [1] : vector<8x8xf32> to vector<8xf32>
    %117 = vector.shape_cast %116 : vector<8xf32> to vector<8x1xf32>
    %118 = vector.broadcast %117 : vector<8x1xf32> to vector<8x8xf32>
    %119 = arith.divf %115, %118 : vector<8x8xf32>
    %120 = arith.truncf %119 : vector<8x8xf32> to vector<8x8xbf16>
    %cst_43 = arith.constant dense<0.000000e+00> : vector<8x16xf32>
    %121 = tpu.matmul %120, %107, %cst_43 {dimension_numbers = #tpu.dot_dimension_numbers<[1], [0], [0], [1], [0, 0, 1, 1], [], []>} : vector<8x8xbf16>, vector<8x16xbf16>, vector<8x16xf32> -> vector<8x16xf32>
    %122 = vector.extract_strided_slice %9 {offsets = [0, 80], sizes = [8, 16], strides = [1, 1]} : vector<8x128xf32> to vector<8x16xf32>
    %123 = arith.truncf %122 : vector<8x16xf32> to vector<8x16xbf16>
    %124 = vector.extract_strided_slice %15 {offsets = [0, 80], sizes = [8, 16], strides = [1, 1]} : vector<8x128xf32> to vector<8x16xf32>
    %125 = arith.truncf %124 : vector<8x16xf32> to vector<8x16xbf16>
    %126 = vector.extract_strided_slice %21 {offsets = [0, 80], sizes = [8, 16], strides = [1, 1]} : vector<8x128xf32> to vector<8x16xf32>
    %127 = arith.truncf %126 : vector<8x16xf32> to vector<8x16xbf16>
    %cst_44 = arith.constant dense<0.000000e+00> : vector<8x8xf32>
    %128 = tpu.matmul %123, %125, %cst_44 {dimension_numbers = #tpu.dot_dimension_numbers<[1], [1], [0], [0], [0, 0, 1, 0], [], []>} : vector<8x16xbf16>, vector<8x16xbf16>, vector<8x8xf32> -> vector<8x8xf32>
    %cst_45 = arith.constant 2.500000e-01 : f32
    %129 = vector.broadcast %cst_45 : f32 to vector<8x8xf32>
    %130 = arith.mulf %128, %129 : vector<8x8xf32>
    %cst_46 = arith.constant dense<0xFF800000> : vector<8xf32>
    %131 = vector.multi_reduction <maximumf>, %130, %cst_46 [1] : vector<8x8xf32> to vector<8xf32>
    %132 = vector.shape_cast %131 : vector<8xf32> to vector<8x1xf32>
    %133 = vector.broadcast %132 : vector<8x1xf32> to vector<8x8xf32>
    %134 = arith.subf %130, %133 : vector<8x8xf32>
    %135 = math.exp %134 : vector<8x8xf32>
    %cst_47 = arith.constant dense<0.000000e+00> : vector<8xf32>
    %136 = vector.multi_reduction <add>, %135, %cst_47 [1] : vector<8x8xf32> to vector<8xf32>
    %137 = vector.shape_cast %136 : vector<8xf32> to vector<8x1xf32>
    %138 = vector.broadcast %137 : vector<8x1xf32> to vector<8x8xf32>
    %139 = arith.divf %135, %138 : vector<8x8xf32>
    %140 = arith.truncf %139 : vector<8x8xf32> to vector<8x8xbf16>
    %cst_48 = arith.constant dense<0.000000e+00> : vector<8x16xf32>
    %141 = tpu.matmul %140, %127, %cst_48 {dimension_numbers = #tpu.dot_dimension_numbers<[1], [0], [0], [1], [0, 0, 1, 1], [], []>} : vector<8x8xbf16>, vector<8x16xbf16>, vector<8x16xf32> -> vector<8x16xf32>
    %142 = vector.extract_strided_slice %9 {offsets = [0, 96], sizes = [8, 16], strides = [1, 1]} : vector<8x128xf32> to vector<8x16xf32>
    %143 = arith.truncf %142 : vector<8x16xf32> to vector<8x16xbf16>
    %144 = vector.extract_strided_slice %15 {offsets = [0, 96], sizes = [8, 16], strides = [1, 1]} : vector<8x128xf32> to vector<8x16xf32>
    %145 = arith.truncf %144 : vector<8x16xf32> to vector<8x16xbf16>
    %146 = vector.extract_strided_slice %21 {offsets = [0, 96], sizes = [8, 16], strides = [1, 1]} : vector<8x128xf32> to vector<8x16xf32>
    %147 = arith.truncf %146 : vector<8x16xf32> to vector<8x16xbf16>
    %cst_49 = arith.constant dense<0.000000e+00> : vector<8x8xf32>
    %148 = tpu.matmul %143, %145, %cst_49 {dimension_numbers = #tpu.dot_dimension_numbers<[1], [1], [0], [0], [0, 0, 1, 0], [], []>} : vector<8x16xbf16>, vector<8x16xbf16>, vector<8x8xf32> -> vector<8x8xf32>
    %cst_50 = arith.constant 2.500000e-01 : f32
    %149 = vector.broadcast %cst_50 : f32 to vector<8x8xf32>
    %150 = arith.mulf %148, %149 : vector<8x8xf32>
    %cst_51 = arith.constant dense<0xFF800000> : vector<8xf32>
    %151 = vector.multi_reduction <maximumf>, %150, %cst_51 [1] : vector<8x8xf32> to vector<8xf32>
    %152 = vector.shape_cast %151 : vector<8xf32> to vector<8x1xf32>
    %153 = vector.broadcast %152 : vector<8x1xf32> to vector<8x8xf32>
    %154 = arith.subf %150, %153 : vector<8x8xf32>
    %155 = math.exp %154 : vector<8x8xf32>
    %cst_52 = arith.constant dense<0.000000e+00> : vector<8xf32>
    %156 = vector.multi_reduction <add>, %155, %cst_52 [1] : vector<8x8xf32> to vector<8xf32>
    %157 = vector.shape_cast %156 : vector<8xf32> to vector<8x1xf32>
    %158 = vector.broadcast %157 : vector<8x1xf32> to vector<8x8xf32>
    %159 = arith.divf %155, %158 : vector<8x8xf32>
    %160 = arith.truncf %159 : vector<8x8xf32> to vector<8x8xbf16>
    %cst_53 = arith.constant dense<0.000000e+00> : vector<8x16xf32>
    %161 = tpu.matmul %160, %147, %cst_53 {dimension_numbers = #tpu.dot_dimension_numbers<[1], [0], [0], [1], [0, 0, 1, 1], [], []>} : vector<8x8xbf16>, vector<8x16xbf16>, vector<8x16xf32> -> vector<8x16xf32>
    %162 = vector.extract_strided_slice %9 {offsets = [0, 112], sizes = [8, 16], strides = [1, 1]} : vector<8x128xf32> to vector<8x16xf32>
    %163 = arith.truncf %162 : vector<8x16xf32> to vector<8x16xbf16>
    %164 = vector.extract_strided_slice %15 {offsets = [0, 112], sizes = [8, 16], strides = [1, 1]} : vector<8x128xf32> to vector<8x16xf32>
    %165 = arith.truncf %164 : vector<8x16xf32> to vector<8x16xbf16>
    %166 = vector.extract_strided_slice %21 {offsets = [0, 112], sizes = [8, 16], strides = [1, 1]} : vector<8x128xf32> to vector<8x16xf32>
    %167 = arith.truncf %166 : vector<8x16xf32> to vector<8x16xbf16>
    %cst_54 = arith.constant dense<0.000000e+00> : vector<8x8xf32>
    %168 = tpu.matmul %163, %165, %cst_54 {dimension_numbers = #tpu.dot_dimension_numbers<[1], [1], [0], [0], [0, 0, 1, 0], [], []>} : vector<8x16xbf16>, vector<8x16xbf16>, vector<8x8xf32> -> vector<8x8xf32>
    %cst_55 = arith.constant 2.500000e-01 : f32
    %169 = vector.broadcast %cst_55 : f32 to vector<8x8xf32>
    %170 = arith.mulf %168, %169 : vector<8x8xf32>
    %cst_56 = arith.constant dense<0xFF800000> : vector<8xf32>
    %171 = vector.multi_reduction <maximumf>, %170, %cst_56 [1] : vector<8x8xf32> to vector<8xf32>
    %172 = vector.shape_cast %171 : vector<8xf32> to vector<8x1xf32>
    %173 = vector.broadcast %172 : vector<8x1xf32> to vector<8x8xf32>
    %174 = arith.subf %170, %173 : vector<8x8xf32>
    %175 = math.exp %174 : vector<8x8xf32>
    %cst_57 = arith.constant dense<0.000000e+00> : vector<8xf32>
    %176 = vector.multi_reduction <add>, %175, %cst_57 [1] : vector<8x8xf32> to vector<8xf32>
    %177 = vector.shape_cast %176 : vector<8xf32> to vector<8x1xf32>
    %178 = vector.broadcast %177 : vector<8x1xf32> to vector<8x8xf32>
    %179 = arith.divf %175, %178 : vector<8x8xf32>
    %180 = arith.truncf %179 : vector<8x8xf32> to vector<8x8xbf16>
    %cst_58 = arith.constant dense<0.000000e+00> : vector<8x16xf32>
    %181 = tpu.matmul %180, %167, %cst_58 {dimension_numbers = #tpu.dot_dimension_numbers<[1], [0], [0], [1], [0, 0, 1, 1], [], []>} : vector<8x8xbf16>, vector<8x16xbf16>, vector<8x16xf32> -> vector<8x16xf32>
    %182 = tpu.concatenate %41, %61, %81, %101, %121, %141, %161, %181 in 1 : vector<8x16xf32>, vector<8x16xf32>, vector<8x16xf32>, vector<8x16xf32>, vector<8x16xf32>, vector<8x16xf32>, vector<8x16xf32>, vector<8x16xf32> -> vector<8x128xf32>
    %183 = arith.truncf %182 : vector<8x128xf32> to vector<8x128xbf16>
    %c0_59 = arith.constant 0 : index
    %c0_60 = arith.constant 0 : index
    %184 = vector.load %arg10[%c0_59, %c0_60] : memref<128x128xbf16, #tpu.memory_space<vmem>>, vector<128x128xbf16>
    %cst_61 = arith.constant dense<0.000000e+00> : vector<8x128xf32>
    %185 = tpu.matmul %183, %184, %cst_61 {dimension_numbers = #tpu.dot_dimension_numbers<[1], [0], [0], [1], [0, 0, 1, 1], [], []>} : vector<8x128xbf16>, vector<128x128xbf16>, vector<8x128xf32> -> vector<8x128xf32>
    %c0_62 = arith.constant 0 : index
    %c0_63 = arith.constant 0 : index
    %186 = vector.load %arg11[%c0_62, %c0_63] : memref<1x128xf32, #tpu.memory_space<vmem>>, vector<1x128xf32>
    %187 = vector.broadcast %186 : vector<1x128xf32> to vector<8x128xf32>
    %188 = arith.addf %185, %187 : vector<8x128xf32>
    %c0_64 = arith.constant 0 : index
    %189 = memref.load %arg1[%c0_64] : memref<4xf32, #tpu.memory_space<smem>>
    %c1 = arith.constant 1 : index
    %190 = memref.load %arg1[%c1] : memref<4xf32, #tpu.memory_space<smem>>
    %c2 = arith.constant 2 : index
    %191 = memref.load %arg1[%c2] : memref<4xf32, #tpu.memory_space<smem>>
    %c3 = arith.constant 3 : index
    %192 = memref.load %arg1[%c3] : memref<4xf32, #tpu.memory_space<smem>>
    %193 = vector.broadcast %189 : f32 to vector<8x128xf32>
    %194 = arith.mulf %193, %188 : vector<8x128xf32>
    %195 = vector.broadcast %190 : f32 to vector<8x128xf32>
    %196 = arith.mulf %195, %3 : vector<8x128xf32>
    %197 = arith.addf %194, %196 : vector<8x128xf32>
    %198 = arith.truncf %197 : vector<8x128xf32> to vector<8x128xbf16>
    %c0_65 = arith.constant 0 : index
    %c0_66 = arith.constant 0 : index
    %199 = vector.load %arg12[%c0_65, %c0_66] : memref<128x512xbf16, #tpu.memory_space<vmem>>, vector<128x512xbf16>
    %cst_67 = arith.constant dense<0.000000e+00> : vector<8x512xf32>
    %200 = tpu.matmul %198, %199, %cst_67 {dimension_numbers = #tpu.dot_dimension_numbers<[1], [0], [0], [1], [0, 0, 1, 1], [], []>} : vector<8x128xbf16>, vector<128x512xbf16>, vector<8x512xf32> -> vector<8x512xf32>
    %c0_68 = arith.constant 0 : index
    %c0_69 = arith.constant 0 : index
    %201 = vector.load %arg13[%c0_68, %c0_69] : memref<1x512xf32, #tpu.memory_space<vmem>>, vector<1x512xf32>
    %202 = vector.broadcast %201 : vector<1x512xf32> to vector<8x512xf32>
    %203 = arith.addf %200, %202 : vector<8x512xf32>
    %cst_70 = arith.constant 0.000000e+00 : f32
    %204 = vector.broadcast %cst_70 : f32 to vector<8x512xf32>
    %205 = arith.maximumf %203, %204 : vector<8x512xf32>
    %206 = arith.truncf %205 : vector<8x512xf32> to vector<8x512xbf16>
    %c0_71 = arith.constant 0 : index
    %c0_72 = arith.constant 0 : index
    %207 = vector.load %arg14[%c0_71, %c0_72] : memref<512x128xbf16, #tpu.memory_space<vmem>>, vector<512x128xbf16>
    %cst_73 = arith.constant dense<0.000000e+00> : vector<8x128xf32>
    %208 = tpu.matmul %206, %207, %cst_73 {dimension_numbers = #tpu.dot_dimension_numbers<[1], [0], [0], [1], [0, 0, 1, 1], [], []>} : vector<8x512xbf16>, vector<512x128xbf16>, vector<8x128xf32> -> vector<8x128xf32>
    %c0_74 = arith.constant 0 : index
    %c0_75 = arith.constant 0 : index
    %209 = vector.load %arg15[%c0_74, %c0_75] : memref<1x128xf32, #tpu.memory_space<vmem>>, vector<1x128xf32>
    %210 = vector.broadcast %209 : vector<1x128xf32> to vector<8x128xf32>
    %211 = arith.addf %208, %210 : vector<8x128xf32>
    %212 = vector.broadcast %191 : f32 to vector<8x128xf32>
    %213 = arith.mulf %212, %197 : vector<8x128xf32>
    %214 = vector.broadcast %192 : f32 to vector<8x128xf32>
    %215 = arith.mulf %214, %211 : vector<8x128xf32>
    %216 = arith.addf %213, %215 : vector<8x128xf32>
    %c0_76 = arith.constant 0 : index
    %c0_77 = arith.constant 0 : index
    %c0_78 = arith.constant 0 : index
    %217 = vector.load %arg16[%c0_76, %c0_77, %c0_78] : memref<1x8x128xf32, #tpu.memory_space<vmem>>, vector<1x8x128xf32>
    %218 = vector.shape_cast %217 : vector<1x8x128xf32> to vector<8x128xf32>
    %219 = vector.shape_cast %216 : vector<8x128xf32> to vector<1x8x128xf32>
    tpu.vector_store %arg16[%c0_76, %c0_77, %c0_78], %219 {strides = array<i32>} : memref<1x8x128xf32, #tpu.memory_space<vmem>>, vector<1x8x128xf32>,
    return
  }
  func.func @transform_0(%arg0: i32) -> i32 {
    %c0_i32 = arith.constant 0 : i32
    %c0_i32_0 = arith.constant 0 : i32
    return %c0_i32 : i32
  }
  func.func @transform_1(%arg0: i32) -> (i32, i32, i32) {
    %c0_i32 = arith.constant 0 : i32
    %c0_i32_0 = arith.constant 0 : i32
    %c0_i32_1 = arith.constant 0 : i32
    return %arg0, %c0_i32, %c0_i32_0 : i32, i32, i32
  }
  func.func @transform_2(%arg0: i32) -> (i32, i32, i32) {
    %c0_i32 = arith.constant 0 : i32
    %c0_i32_0 = arith.constant 0 : i32
    %c0_i32_1 = arith.constant 0 : i32
    return %arg0, %c0_i32, %c0_i32_0 : i32, i32, i32
  }
  func.func @transform_3(%arg0: i32) -> (i32, i32) {
    %c0_i32 = arith.constant 0 : i32
    %c0_i32_0 = arith.constant 0 : i32
    %c0_i32_1 = arith.constant 0 : i32
    return %c0_i32, %c0_i32_0 : i32, i32
  }
  func.func @transform_4(%arg0: i32) -> (i32, i32) {
    %c0_i32 = arith.constant 0 : i32
    %c0_i32_0 = arith.constant 0 : i32
    %c0_i32_1 = arith.constant 0 : i32
    return %c0_i32, %c0_i32_0 : i32, i32
  }
  func.func @transform_5(%arg0: i32) -> (i32, i32) {
    %c0_i32 = arith.constant 0 : i32
    %c0_i32_0 = arith.constant 0 : i32
    %c0_i32_1 = arith.constant 0 : i32
    return %c0_i32, %c0_i32_0 : i32, i32
  }
  func.func @transform_6(%arg0: i32) -> (i32, i32) {
    %c0_i32 = arith.constant 0 : i32
    %c0_i32_0 = arith.constant 0 : i32
    %c0_i32_1 = arith.constant 0 : i32
    return %c0_i32, %c0_i32_0 : i32, i32
  }
  func.func @transform_7(%arg0: i32) -> (i32, i32) {
    %c0_i32 = arith.constant 0 : i32
    %c0_i32_0 = arith.constant 0 : i32
    %c0_i32_1 = arith.constant 0 : i32
    return %c0_i32, %c0_i32_0 : i32, i32
  }
  func.func @transform_8(%arg0: i32) -> (i32, i32) {
    %c0_i32 = arith.constant 0 : i32
    %c0_i32_0 = arith.constant 0 : i32
    %c0_i32_1 = arith.constant 0 : i32
    return %c0_i32, %c0_i32_0 : i32, i32
  }
  func.func @transform_9(%arg0: i32) -> (i32, i32) {
    %c0_i32 = arith.constant 0 : i32
    %c0_i32_0 = arith.constant 0 : i32
    %c0_i32_1 = arith.constant 0 : i32
    return %c0_i32, %c0_i32_0 : i32, i32
  }
  func.func @transform_10(%arg0: i32) -> (i32, i32) {
    %c0_i32 = arith.constant 0 : i32
    %c0_i32_0 = arith.constant 0 : i32
    %c0_i32_1 = arith.constant 0 : i32
    return %c0_i32, %c0_i32_0 : i32, i32
  }
  func.func @transform_11(%arg0: i32) -> (i32, i32) {
    %c0_i32 = arith.constant 0 : i32
    %c0_i32_0 = arith.constant 0 : i32
    %c0_i32_1 = arith.constant 0 : i32
    return %c0_i32, %c0_i32_0 : i32, i32
  }
  func.func @transform_12(%arg0: i32) -> (i32, i32) {
    %c0_i32 = arith.constant 0 : i32
    %c0_i32_0 = arith.constant 0 : i32
    %c0_i32_1 = arith.constant 0 : i32
    return %c0_i32, %c0_i32_0 : i32, i32
  }
  func.func @transform_13(%arg0: i32) -> (i32, i32) {
    %c0_i32 = arith.constant 0 : i32
    %c0_i32_0 = arith.constant 0 : i32
    %c0_i32_1 = arith.constant 0 : i32
    return %c0_i32, %c0_i32_0 : i32, i32
  }
  func.func @transform_14(%arg0: i32) -> (i32, i32) {
    %c0_i32 = arith.constant 0 : i32
    %c0_i32_0 = arith.constant 0 : i32
    %c0_i32_1 = arith.constant 0 : i32
    return %c0_i32, %c0_i32_0 : i32, i32
  }
  func.func @transform_15(%arg0: i32) -> (i32, i32, i32) {
    %c0_i32 = arith.constant 0 : i32
    %c0_i32_0 = arith.constant 0 : i32
    %c0_i32_1 = arith.constant 0 : i32
    return %arg0, %c0_i32, %c0_i32_0 : i32, i32, i32
  }
}

</mosaic_0001>

<bundles_post_ra>
// kernel: tpu_custom_call.1
= control target key start
LH: loop header
LB: loop body
LE: loop exit
PB: predicated region body
PF: predicated region fallthrough
CT: control target
= control target key end

     0   :  { %s3915_s0 = inlined_call_operand.hbm [shape: f32[4], index: 0, kind: input, shape index: {}]   ;;  %s3916_s1 = inlined_call_operand.hbm [shape: f32[2,8,128], index: 1, kind: input, shape index: {}]   ;;  %s3917_s2 = inlined_call_operand.hbm [shape: f32[2,8,128], index: 2, kind: input, shape index: {}]   ;;  %s3918_s3 = inlined_call_operand.hbm [shape: bf16[128,128], index: 3, kind: input, shape index: {}]   ;;  %s3919_s4 = inlined_call_operand.vmem [shape: f32[1,128], index: 4, kind: input, shape index: {}]   ;;  %s3920_s5 = inlined_call_operand.hbm [shape: bf16[128,128], index: 5, kind: input, shape index: {}]   ;;  %s3921_s6 = inlined_call_operand.vmem [shape: f32[1,128], index: 6, kind: input, shape index: {}]   ;;  %s3922_s7 = inlined_call_operand.hbm [shape: bf16[128,128], index: 7, kind: input, shape index: {}]   ;;  %s3923_s8 = inlined_call_operand.vmem [shape: f32[1,128], index: 8, kind: input, shape index: {}]   ;;  %s3924_s9 = inlined_call_operand.hbm [shape: bf16[128,128], index: 9, kind: input, shape index: {}]   ;;  %s3925_s10 = inlined_call_operand.vmem [shape: f32[1,128], index: 10, kind: input, shape index: {}]   ;;  %s3926_s11 = inlined_call_operand.hbm [shape: bf16[128,512], index: 11, kind: input, shape index: {}]   ;;  %s3927_s12 = inlined_call_operand.vmem [shape: f32[1,512], index: 12, kind: input, shape index: {}]   ;;  %s3928_s13 = inlined_call_operand.hbm [shape: bf16[512,128], index: 13, kind: input, shape index: {}]   ;;  %s3929_s14 = inlined_call_operand.vmem [shape: f32[1,128], index: 14, kind: input, shape index: {}]   ;;  %s3930_s15 = inlined_call_operand.hbm [shape: f32[2,8,128], index: 15, kind: output, shape index: {}]  }
   0x1   :  { %3936 = sst [smem:[#allocation31_spill]] %s3915_s0 }
   0x2   :  { %3937 = sst [smem:[#allocation32_spill]] %s3918_s3 }
   0x3   :  { %3938 = sst [smem:[#allocation33_spill]] %s3920_s5 }
   0x4   :  { %3939 = sst [smem:[#allocation34_spill]] %s3922_s7 }
   0x5   :  { %3940 = sst [smem:[#allocation35_spill]] %s3924_s9 }
   0x6   :  { %3941 = sst [smem:[#allocation36_spill]] %s3926_s11 }
   0x7   :  { %3942 = sst [smem:[#allocation37_spill]] %s3927_s12 }
   0x8   :  { %3943 = sst [smem:[#allocation38_spill]] %s3928_s13 }
   0x9   :  { %3944 = sst [smem:[#allocation39_spill]] %s3929_s14 }
   0xa   :  { %3945 = sst [smem:[#allocation40_spill]] %s3930_s15 }
   0xb   :  { %20 = vsyncpa [#allocation5], 0 }
   0xc   :  { %21 = vsyncpa [#allocation3], 0 }
   0xd   :  { %23 = vsyncpa [#allocation3 + $0x1], 0 }
   0xe   :  { %24 = vsyncpa [#allocation8], 0 }
   0xf   :  { %26 = vsyncpa [#allocation8 + $0x1], 0 }
  0x10   :  { %27 = vsyncpa [#allocation11], 0 }
  0x11   :  { %28 = vsyncpa [#allocation14], 0 }
  0x12   :  { %29 = vsyncpa [#allocation17], 0 }
  0x13   :  { %30 = vsyncpa [#allocation4], 0 }
  0x14   :  { %32 = vsyncpa [#allocation4 + $0x1], 0  ;;  %s3510_s18 = smov 0   ;;  %s3512_s19 = smov 0  }
  0x15   :  { %s3514_s20 = smov 0   ;;  %s3516_s21 = smov 0  }
  0x16 LB: > { %3946 = sst [smem:[#allocation27_spill]] %s3406_s20  ;;  %s3534_s25 = sadd.s32 4294967295, %s3410_s21   ;;  %s3410_s21 = sphi %s3516_s21, %s3969_s21   ;;  %s3406_s20 = sphi %s3514_s20, %s3971_s20   ;;  %s3402_s19 = sphi %s3512_s19, %s3973_s19   ;;  %s3398_s18 = sphi %s3510_s18, %s3972_s18  }
  0x17   : > { %3947 = sst [smem:[#allocation28_spill]] %s3410_s21  ;;  %p2367_p0 = scmp.ge.s32.totalorder %s3410_s21, 1 }
  0x18   : > { %s3948_s3 = sld [smem:[#allocation32_spill]]  ;;  %p80_p1 = scmp.eq.s32.totalorder %s3534_s25, 0 }
  0x19   : > { %p394_p2 = scmp.lt.s32.totalorder %s3410_s21, 3  ;;  %s3412_s27 = smov [#allocation9]  }
  0x1a   : > { %s417_s28 = sshll.u32 %s3412_s27, 4  ;;  %s3950_s5 = sld [smem:[#allocation33_spill]]  ;;  %s418_s28 = int_to_ptr.vmem [resolvable:$true] %s417_s28 }
  0x1b   : > { %p3539_p3 = pnand %p2367_p0, %p394_p2  ;;  %s3952_s9 = sld [smem:[#allocation35_spill]] }
  0x1c   : > { %s3414_s14 = smov 64   ;;  %s3415_s12 = smov 4  }
  0x1d   : > { %p2928_p4 = pneg %p3539_p3  ;;  %s3953_s0 = sld [smem:[#allocation31_spill]] }
  0x1e   : > { %s415_s24 = sshll.u32 %s3948_s3, 4  ;;  %s3413_s3 = smov [#allocation10]   ;;  %s416_s24 = int_to_ptr.hbm [resolvable:$true] %s415_s24 }
  0x1f   : > { %p3551_p6 = pnand %p2928_p4, %p80_p1  ;;  %s434_s15 = sshll.u32 %s3413_s3, 4  ;;  %s435_s15 = int_to_ptr.vmem [resolvable:$true] %s434_s15 }
  0x20   : > { %s432_s16 = sshll.u32 %s3950_s5, 4  ;;  %s3416_s3 = smov [#allocation13]   ;;  %s433_s16 = int_to_ptr.hbm [resolvable:$true] %s432_s16 }
  0x21   : > { %s466_s27 = sshll.u32 %s3952_s9, 4  ;;  %s468_s23 = sshll.u32 %s3416_s3, 4  ;;  %s467_s27 = int_to_ptr.hbm [resolvable:$true] %s466_s27  ;;  %s469_s23 = int_to_ptr.vmem [resolvable:$true] %s468_s23 }
  0x22   : > { %2934 = dma.hbm_to_vmem [thread:$0]  (!%p3551_p6), %s416_s24, 1024, %s418_s28, [#allocation8], %s3414_s14, %s3414_s14, %s3415_s12  }
  0x23   : > { %2937 = dma.hbm_to_vmem [thread:$0]  (!%p3551_p6), %s433_s16, 1024, %s435_s15, [#allocation11], %s3414_s14, %s3414_s14, %s3415_s12  }
  0x24   : > { %s406_s22 = sshll.u32 %s3953_s0, 4  ;;  %s3417_s24 = smov [#allocation2]   ;;  %s407_s22 = int_to_ptr.hbm [resolvable:$true] %s406_s22 }
  0x25   : > { %2943 = dma.hbm_to_vmem [thread:$0]  (!%p3551_p6), %s467_s27, 1024, %s469_s23, [#allocation14], %s3414_s14, %s3414_s14, %s3415_s12  }
  0x26   : > { %2931 = dma.hbm_to_smem (!%p3551_p6), %s407_s22, 16, %s3417_s24, [#allocation5]  }
  0x27   : > { %s3954_s7 = sld [smem:[#allocation34_spill]]  ;;  %s3418_s16 = smov [#allocation12]  }
  0x28   : > { %s451_s29 = sshll.u32 %s3418_s16, 4  ;;  %s3955_s11 = sld [smem:[#allocation36_spill]]  ;;  %s452_s29 = int_to_ptr.vmem [resolvable:$true] %s451_s29 }
  0x29   : > { %s3419_s5 = smov [#allocation15]   ;;  %s3420_s22 = smov 256  }
  0x2a   : > { %s485_s27 = sshll.u32 %s3419_s5, 4  ;;  %s3421_s23 = smov 16   ;;  %s486_s27 = int_to_ptr.vmem [resolvable:$true] %s485_s27 }
  0x2b   : > { %s3956_s13 = sld [smem:[#allocation38_spill]]  ;;  %s3422_s16 = smov [#allocation16]  }
  0x2c   : > { %s2366_s30 = sadd.s32 4294967294, %s3410_s21   ;;  %s3601_s3 = sadd.s32 1, %s3410_s21  }
  0x2d   : > { %s449_s15 = sshll.u32 %s3954_s7, 4  ;;  %3957 = sst [smem:[#allocation29_spill]] %s3601_s3  ;;  %s450_s15 = int_to_ptr.hbm [resolvable:$true] %s449_s15 }
  0x2e   : > { %s483_s0 = sshll.u32 %s3955_s11, 4  ;;  %s63_s5 = ssub.s32 %s3410_s21, %s3601_s3  ;;  %s484_s0 = int_to_ptr.hbm [resolvable:$true] %s483_s0 }
  0x2f   : > { %2940 = dma.hbm_to_vmem [thread:$0]  (!%p3551_p6), %s450_s15, 1024, %s452_s29, [#allocation11], %s3414_s14, %s3414_s14, %s3415_s12  }
  0x30   : > { %2946 = dma.hbm_to_vmem [thread:$0]  (!%p3551_p6), %s484_s0, 4096, %s486_s27, [#allocation14], %s3420_s22, %s3420_s22, %s3421_s23  }
  0x31   : > { %s500_s15 = sshll.u32 %s3956_s13, 4  ;;  %s502_s29 = sshll.u32 %s3422_s16, 4  ;;  %s501_s15 = int_to_ptr.hbm [resolvable:$true] %s500_s15  ;;  %s503_s29 = int_to_ptr.vmem [resolvable:$true] %s502_s29 }
  0x32   : > { %2949 = dma.hbm_to_vmem [thread:$0]  (!%p3551_p6), %s501_s15, 4096, %s503_s29, [#allocation17], %s3414_s14, %s3414_s14, %s3415_s12  }
  0x33   : > { %s66_s0 = sadd.s32 1, %s3406_s20  ;;  %p73_p7 = scmp.ne.s32.totalorder %s3406_s20, %s3402_s19 }
  0x34   : > { %p64_p8 = scmp.eq.s32.totalorder %s63_s5, 0  ;;  %p74_p9 = scmp.eq.s32.totalorder %s3410_s21, 0 }
  0x35   : > { %p79_p10 = scmp.ne.s32.totalorder %s3402_s19, %s3398_s18  ;;  %p381_p11 = scmp.eq.s32.totalorder %s3534_s25, 1 }
  0x36   : > { %s3613_s27 = scalar_select %p64_p8, %s3406_s20, %s66_s0  }
  0x37   : > { %p3615_p12 = por %p74_p9, %p73_p7  ;;  %p3621_p13 = por %p80_p1, %p79_p10 }
  0x38   : > { %3958 = sst [smem:[#allocation30_spill]] %s3613_s27  ;;  %p3625_p0 = por %p381_p11, %p73_p7 }
  0x39   : > { %p387_p2 = scmp.eq.s32.totalorder %s2366_s30, 1  ;;  %p2968_p4 = scmp.lt.s32.totalorder %s3410_s21, 2 }
  0x3a   : > { %s519_s22 = sand.u32 1, %s3406_s20   ;;  %s2377_s28 = sshll.u32 %s3410_s21, 3 }
  0x3b   : > { %p3631_p6 = por %p387_p2, %p79_p10  ;;  %s2376_s24 = sshll.u32 %s519_s22, 3 }
  0x3c   : > { %s527_s29 = scalar_lea.hbm %s3916_s1, %s2377_s28  ;;  %s523_s5 = scalar_lea.vmem [#allocation6], %s2376_s24 }
  0x3d   : > { %s529_s0 = sshll.u32 %s527_s29, 4  ;;  %s531_s7 = sshll.u32 %s523_s5, 4  ;;  %s530_s0 = int_to_ptr.hbm [resolvable:$true] %s529_s0  ;;  %s532_s7 = int_to_ptr.vmem [resolvable:$true] %s531_s7 }
  0x3e   : > { %p3641_p7 = pnand %p2968_p4, %p3615_p12  ;;  %s546_s13 = scalar_lea.hbm %s3917_s2, %s2377_s28 }
  0x3f   : > { %s538_s27 = sand.u32 1, %s3410_s21   ;;  %s520_s20 = scalar_lea.sflag [#allocation3], %s519_s22 }
  0x40   : > { %s3260_s15 = sshra.s32 %s530_s0, 4  ;;  %p3264_p9 = pneg %p3641_p7  ;;  %s3261_s15 = int_to_ptr.hbm [resolvable:$true] %s3260_s15 }
  0x41   : > { %s3262_s16 = scalar_lea.hbm %s3261_s15, 8  ;;  %s3267_s5 = scalar_lea.hbm %s3916_s1, 16 }
  0x42   : > { %p3263_p8 = scmp.ne.s32.totalorder %s3261_s15, %s3262_s16  ;;  %p3268_p12 = scmp.lt.s32.totalorder %s3261_s15, %s3916_s1 }
  0x43   : > { %p3269_p2 = scmp.lt.s32.totalorder %s3267_s5, %s3262_s16 }
  0x44   : > { %p3265_p10 = pnand %p3264_p9, %p3263_p8 }
  0x45   : > { %p3270_p4 = por %p3269_p2, %p3268_p12 }
  0x46   : > { %p3266_p11 = pneg %p3265_p10 }
  0x48   : > { %p3271_p5 = pnand %p3270_p4, %p3266_p11 }
  0x4a   : > { %3274 = shalt.err (!%p3271_p5)
}
  0x4b   : > { %2953 = dma.hbm_to_vmem [thread:$0]  (!%p3641_p7), %s530_s0, 128, %s532_s7, %s520_s20  }
  0x4c   : > { %s548_s22 = sshll.u32 %s546_s13, 4  ;;  %s542_s28 = scalar_lea.vmem [#allocation7], %s2376_s24  ;;  %s549_s22 = int_to_ptr.hbm [resolvable:$true] %s548_s22 }
  0x4d   : > { %s550_s3 = sshll.u32 %s542_s28, 4  ;;  %s539_s21 = scalar_lea.sflag [#allocation8], %s538_s27  ;;  %s551_s3 = int_to_ptr.vmem [resolvable:$true] %s550_s3 }
  0x4e   : > { %s3290_s17 = sshra.s32 %s549_s22, 4  ;;  %s3297_s5 = scalar_lea.hbm %s3917_s2, 16  ;;  %s3291_s17 = int_to_ptr.hbm [resolvable:$true] %s3290_s17 }
  0x4f   : > { %s3292_s29 = scalar_lea.hbm %s3291_s17, 8  ;;  %p3298_p5 = scmp.lt.s32.totalorder %s3291_s17, %s3917_s2 }
  0x50   : > { %p3293_p8 = scmp.ne.s32.totalorder %s3291_s17, %s3292_s29  ;;  %p3299_p11 = scmp.lt.s32.totalorder %s3297_s5, %s3292_s29 }
  0x52   : > { %p3295_p10 = pnand %p3293_p8, %p3264_p9  ;;  %p3300_p2 = por %p3299_p11, %p3298_p5 }
  0x54   : > { %p3296_p12 = pneg %p3295_p10 }
  0x56   : > { %p3301_p4 = pnand %p3300_p2, %p3296_p12 }
  0x58   : > { %3304 = shalt.err (!%p3301_p4)
}
  0x59   : > { %2956 = dma.hbm_to_vmem [thread:$0]  (!%p3641_p7), %s549_s22, 128, %s551_s3, %s539_s21  }
  0x5a   : > { %559 = sbr.rel (%p3539_p3) target bundleno = 1844 (0x734), region = 80 }
  0x5f   : > { %3365 = dma.done.wait (%p80_p1), [#allocation5], 16  }
  0x60   : > { %3367 = vsyncadd (%p80_p1), [#allocation5], 4294967280  ;;  %s3680_s13 = sand.u32 1, %s3402_s19  }
  0x61   : > { %s3683_s20 = sshll.u32 %s3680_s13, 3  ;;  %s567_s27 = scalar_lea.sflag [#allocation3], %s3680_s13 }
  0x62   : > { %s570_s21 = scalar_lea.vmem [#allocation6], %s3683_s20 }
  0x63   : > { %3369 = dma.done.wait (%p3621_p13), %s567_s27, 128  }
  0x64   : > { %3371 = vsyncadd (%p3621_p13), %s567_s27, 4294967168  ;;  %s576_s26 = sand.u32 1, %s3534_s25   ;;  %s580_s24 = scalar_lea.vmem [#allocation7], %s3683_s20 }
  0x65   : > { %s577_s3 = scalar_lea.sflag [#allocation8], %s576_s26 }
  0x66   : > { %3373 = dma.done.wait (%p3621_p13), %s577_s3, 128  }
  0x67   : > { %3375 = vsyncadd (%p3621_p13), %s577_s3, 4294967168 }
  0x68   : > { %3377 = dma.done.wait (%p80_p1), [#allocation8], 1024  }
  0x69   : > { %3379 = vsyncadd (%p80_p1), [#allocation8], 4294966272 }
  0x6a   : > { %3381 = dma.done.wait (%p80_p1), [#allocation11], 2048  }
  0x6b   : > { %3383 = vsyncadd (%p80_p1), [#allocation11], 4294965248 }
  0x6c   : > { %3385 = dma.done.wait (%p80_p1), [#allocation14], 5120  }
  0x6d   : > { %3387 = vsyncadd (%p80_p1), [#allocation14], 4294962176 }
  0x6e   : > { %3389 = dma.done.wait (%p80_p1), [#allocation17], 4096  }
  0x6f   : > { %3391 = vsyncadd (%p80_p1), [#allocation17], 4294963200 }
  0x70   : > { %616 = sfence }
  0x71   : > { %v2805_v0 = vld [vmem:[#allocation9 + $0x38] sm:$0xff]  ;;  %v2804_v2 = vld [vmem:[#allocation9 + $0x30] sm:$0xff]  ;;  %v2803_v4 = vld [vmem:[#allocation9 + $0x28] sm:$0xff]  ;;  %vm915_vm0 = vcmask 130048   ;;  %s3423_s22 = smov 96   ;;  %s3424_s28 = smov 112  }
  0x72   : > { %v2813_v1 = vld [vmem:[#allocation10 + $0x38] sm:$0xff]  ;;  %736 = vmatpush.bf16.msra.mxu0 %v2805_v0  ;;  %v2812_v3 = vld [vmem:[#allocation10 + $0x30] sm:$0xff]  ;;  %v2811_v5 = vld [vmem:[#allocation10 + $0x28] sm:$0xff]  ;;  %s3425_s17 = smov 80   ;;  %s3426_s29 = smov 64   ;;  %vm965_vm1 = vcmask 1043456  }
  0x73   : > { %818 = vmatpush.bf16.msra.mxu1 %v2813_v1  ;;  %v2821_v6 = vld [vmem:[#allocation12 + $0x38] sm:$0xff]  ;;  %v2820_v7 = vld [vmem:[#allocation12 + $0x30] sm:$0xff]  ;;  %v2802_v8 = vld [vmem:[#allocation9 + $0x20] sm:$0xff]  ;;  %s3427_s15 = smov 48   ;;  %s3428_s16 = smov 32   ;;  %vm936_vm2 = vcmask 64512  }
  0x74   : > { %899 = vmatpush.bf16.msra.mxu2 %v2821_v6  ;;  %v2810_v9 = vld [vmem:[#allocation10 + $0x20] sm:$0xff]  ;;  %v2819_v10 = vld [vmem:[#allocation12 + $0x28] sm:$0xff]  ;;  %v2801_v11 = vld [vmem:[#allocation9 + $0x18] sm:$0xff]  ;;  %s3429_s5 = smov 16   ;;  %s2535_s27 = sld [smem:[#allocation2 + $0x1]] }
  0x75   : > { %v2809_v12 = vld [vmem:[#allocation10 + $0x18] sm:$0xff]  ;;  %v2818_v13 = vld [vmem:[#allocation12 + $0x20] sm:$0xff]  ;;  %v2800_v14 = vld [vmem:[#allocation9 + $0x10] sm:$0xff]  ;;  %s3964_s0 = sld [smem:[#allocation37_spill]]  ;;  %s663_s7 = scalar_lea.vmem [#allocation18], %s3683_s20 }
  0x76   : > { %737 = vmatpush.bf16.msra.mxu0 %v2804_v2  ;;  %v2808_v15 = vld [vmem:[#allocation10 + $0x10] sm:$0xff]  ;;  %v2817_v16 = vld [vmem:[#allocation12 + $0x18] sm:$0xff]  ;;  %v2799_v17 = vld [vmem:[#allocation9 + $0x8] sm:$0xff]  ;;  %s2536_s30 = sld [smem:[#allocation2 + $0x2]] }
  0x77   : > { %819 = vmatpush.bf16.msra.mxu1 %v2812_v3  ;;  %v2807_v18 = vld [vmem:[#allocation10 + $0x8] sm:$0xff]  ;;  %v2816_v19 = vld [vmem:[#allocation12 + $0x10] sm:$0xff]  ;;  %v2798_v20 = vld [vmem:[#allocation9] sm:$0xff] }
  0x78   : > { %900 = vmatpush.bf16.msra.mxu2 %v2820_v7  ;;  %v2806_v21 = vld [vmem:[#allocation10] sm:$0xff]  ;;  %v666_v23 = vld [vmem:[%s580_s24] sm:$0xff]  ;;  %v2815_v24 = vld [vmem:[#allocation12 + $0x8] sm:$0xff] }
  0x79   : > { %v665_v22 = vld [vmem:[%s570_s21] sm:$0xff]  ;;  %v749_v26 = vpack.c.bf16 %v666_v23, %v666_v23  ;;  %v3028_v28 = vld [vmem:[%s3921_s6] ss:$0 sm:$0xff]  ;;  %s1598_s21 = sld [smem:[#allocation2]] }
  0x7a   : > { %738 = vmatpush.bf16.msra.mxu0 %v2803_v4  ;;  %v667_v25 = vpack.c.bf16 %v665_v22, %v665_v22  ;;  %v2814_v27 = vld [vmem:[#allocation12] sm:$0xff]  ;;  %v3027_v31 = vld [vmem:[%s3919_s4] ss:$0 sm:$0xff] }
  0x7b   : > { %820 = vmatpush.bf16.msra.mxu1 %v2811_v5  ;;  %v3029_v39 = vld [vmem:[%s3923_s8] ss:$0 sm:$0xff] }
  0x7c   : > { %901 = vmatpush.bf16.msra.mxu2 %v2819_v10 }
  0x7e   : > { %739 = vmatpush.bf16.msra.mxu0 %v2802_v8 }
  0x7f   : > { %821 = vmatpush.bf16.msra.mxu1 %v2810_v9 }
  0x80   : > { %902 = vmatpush.bf16.msra.mxu2 %v2818_v13 }
  0x82   : > { %740 = vmatpush.bf16.msra.mxu0 %v2801_v11 }
  0x83   : > { %822 = vmatpush.bf16.msra.mxu1 %v2809_v12 }
  0x84   : > { %903 = vmatpush.bf16.msra.mxu2 %v2817_v16 }
  0x86   : > { %741 = vmatpush.bf16.msra.mxu0 %v2800_v14 }
  0x87   : > { %823 = vmatpush.bf16.msra.mxu1 %v2808_v15 }
  0x88   : > { %904 = vmatpush.bf16.msra.mxu2 %v2816_v19 }
  0x8a   : > { %742 = vmatpush.bf16.msra.mxu0 %v2799_v17 }
  0x8b   : > { %824 = vmatpush.bf16.msra.mxu1 %v2807_v18 }
  0x8c   : > { %905 = vmatpush.bf16.msra.mxu2 %v2815_v24 }
  0x8e   : > { %743 = vmatpush.bf16.msra.mxu0 %v2798_v20 }
  0x8f   : > { %825 = vmatpush.bf16.msra.mxu1 %v2806_v21 }
  0x90   : > { %906 = vmatpush.bf16.msra.mxu2 %v2814_v27 }
  0x91   : > { %744 = vmatmul.bf16.vlgmr.msra.gmra.mxu0 %v667_v25 }
  0x92   : > { %826 = vmatmul.bf16.vlgmr.msra.gmra.mxu1 %v749_v26 }
  0x93   : > { %907 = vmatmul.bf16.vlgmr.msra.gmra.mxu2 %v749_v26 }
 0x10e   : > { %v745_v29 = vpop.f32.mrf.mxu0 }
 0x10f   : > { %v827_v30 = vpop.f32.mrf.mxu1  ;;  %v746_v34 = vadd.f32 %v3027_v31, %v745_v29 }
 0x110   : > { %v828_v32 = vadd.f32 %v3028_v28, %v827_v30 }
 0x111   : > { %v912_v38 = vpack.c.bf16 %v746_v34, %v746_v34 }
 0x112   : > { %v3723_v33 = vpack.c.bf16 %v828_v32, %v828_v32 }
 0x114   : > { %1057 = vrot.lane.b32.xlu2 %v3723_v33, %s3423_s22  ;;  %986 = vrot.lane.b32.xlu1 %v3723_v33, %s3424_s28  ;;  %v920_v35 = vsel %vm915_vm0, %v3723_v33, 0 }
 0x115   : > { %929 = vmatpush.bf16.xpose.msra.mxu3 %v920_v35 }
 0x116   : > { %v747_v36 = vpop.f32.mrf.mxu0  ;;  %v908_v40 = vpop.f32.mrf.mxu2 }
 0x117   : > { %v829_v37 = vpop.f32.mrf.mxu1  ;;  %v909_v41 = vadd.f32 %v3029_v39, %v908_v40 }
 0x119   : > { %v3749_v42 = vpack.c.bf16 %v909_v41, %v909_v41 }
 0x11b   : > { %v967_v43 = vsel %vm965_vm1, %v3749_v42, 0 }
 0x11c   : > { %1127 = vrot.lane.b32.xlu2 %v3723_v33, %s3425_s17  ;;  %983 = vrot.lane.b32.xlu1 %v912_v38, %s3424_s28 }
 0x11d   : > { %2487 = vmatmul.msk.bf16.vlgmr.msra.gmra.mxu3 %vm915_vm0, %v912_v38 }
 0x11e   : > { %976 = vmatpush.bf16.msrb.mxu3 %v967_v43  ;;  %v910_v44 = vpop.f32.mrf.mxu2 }
 0x124   : > { %1197 = vrot.lane.b32.xlu2 %v3723_v33, %s3426_s29  ;;  %1125 = vrot.lane.b32.xlu1 %v912_v38, %s3425_s17 }
 0x12c   : > { %1195 = vrot.lane.b32.xlu2 %v912_v38, %s3426_s29  ;;  %1267 = vrot.lane.b32.xlu1 %v3723_v33, %s3427_s15 }
 0x134   : > { %1337 = vrot.lane.b32.xlu2 %v3723_v33, %s3428_s16  ;;  %1265 = vrot.lane.b32.xlu1 %v912_v38, %s3427_s15 }
 0x13c   : > { %1405 = vrot.lane.b32.xlu2 %v912_v38, %s3429_s5  ;;  %1335 = vrot.lane.b32.xlu1 %v912_v38, %s3428_s16 }
 0x16e   : > { %v1058_v45 = vpop.permute.xlu2 %1057 }
 0x16f   : > { %v1063_v46 = vsel %vm915_vm0, %v1058_v45, 0 }
 0x170   : > { %1072 = vmatpush.bf16.xpose.msrb.mxu2 %v1063_v46 }
 0x176   : > { %v1128_v47 = vpop.permute.xlu2 %1127 }
 0x177   : > { %v1133_v25 = vsel %vm915_vm0, %v1128_v47, 0 }
 0x17e   : > { %v1198_v48 = vpop.permute.xlu2 %1197 }
 0x17f   : > { %v1203_v49 = vsel %vm915_vm0, %v1198_v48, 0 }
 0x180   : > { %1212 = vmatpush.bf16.xpose.msrb.mxu1 %v1203_v49 }
 0x186   : > { %v987_v50 = vpop.permute.xlu1 %986  ;;  %v1196_v51 = vpop.permute.xlu2 %1195 }
 0x187   : > { %v992_v52 = vsel %vm915_vm0, %v987_v50, 0  ;;  %2495 = vmatmul.msk.bf16.vlgmr.msrb.gmra.mxu1 %vm915_vm0, %v1196_v51 }
 0x188   : > { %1001 = vmatpush.bf16.xpose.msra.mxu3 %v992_v52 }
 0x18e   : > { %v1338_v53 = vpop.permute.xlu2 %1337  ;;  %v984_v54 = vpop.permute.xlu1 %983 }
 0x18f   : > { %v1343_v55 = vsel %vm915_vm0, %v1338_v53, 0 }
 0x190   : > { %1352 = vmatpush.bf16.xpose.msra.mxu1 %v1343_v55 }
 0x196   : > { %v1126_v56 = vpop.permute.xlu1 %1125  ;;  %v1406_v29 = vpop.permute.xlu2 %1405 }
 0x19e   : > { %v1268_v57 = vpop.permute.xlu1 %1267 }
 0x19f   : > { %v1273_v26 = vsel %vm915_vm0, %v1268_v57, 0 }
 0x1a0   : > { %v931_v58 = vpop.f32.mrf.mxu3 }
 0x1a1   : > { %v935_v59 = vmul.f32 0.25, %v931_v58 }
 0x1a3   : > { %v937_v60 = vsel %vm936_vm2, %v935_v59, -inf }
 0x1a4   : > { %938 = vmax.xlane.f32.xlu0 %v937_v60 }
 0x1a6   : > { %v1266_v61 = vpop.permute.xlu1 %1265 }
 0x1a8   : > { %v933_v62 = vpop.f32.mrf.mxu3 }
 0x1ae   : > { %v1336_v63 = vpop.permute.xlu1 %1335 }
 0x1af   : > { %2499 = vmatmul.msk.bf16.vlgmr.msra.gmra.mxu1 %vm915_vm0, %v1336_v63 }
 0x204   : > { %v1214_v0 = vpop.f32.mrf.mxu1 }
 0x205   : > { %v3764_v9 = vmul.f32 0.25, %v1214_v0 }
 0x207   : > { %v1219_v10 = vsel %vm936_vm2, %v3764_v9, -inf }
 0x20c   : > { %v1216_v1 = vpop.f32.mrf.mxu1 }
 0x217   : > { %v939_v2 = vpop.xlane.xlu0 %938 }
 0x218   : > { %v940_v3 = vsub.f32 %v935_v59, %v939_v2 }
 0x21a   : > { %v941_v4 = vmul.f32 1.442695, %v940_v3 }
 0x21c   : > { %3032 = vpow2.f32 %v941_v4 }
 0x222   : > { %v3033_v5 = vpop.eup %3032 }
 0x223   : > { %v943_v6 = vsel %vm936_vm2, %v3033_v5, 0.0 }
 0x224   : > { %944 = vadd.xlane.f32.xlu0 %v943_v6 }
 0x22c   : > { %v1354_v7 = vpop.f32.mrf.mxu1 }
 0x22d   : > { %v3780_v34 = vmul.f32 0.25, %v1354_v7 }
 0x22f   : > { %v1359_v37 = vsel %vm936_vm2, %v3780_v34, -inf }
 0x234   : > { %v1356_v8 = vpop.f32.mrf.mxu1 }
 0x238   : > { %1055 = vrot.lane.b32.xlu0 %v912_v38, %s3423_s22 }
 0x240   : > { %1407 = vrot.lane.b32.xlu0 %v3723_v33, %s3429_s5 }
 0x26a   : > { %1220 = vmax.xlane.f32.xlu0 %v1219_v10 }
 0x297   : > { %v945_v11 = vpop.xlane.xlu0 %944 }
 0x298   : > { %3034 = vrcp.f32 %v945_v11  ;;  %v957_v15 = vand.u32 2147483648, %v945_v11  ;;  %v955_v17 = vand.u32 2147483647, %v945_v11  ;;  %vm951_vm4 = vweird.f32 %v945_v11 }
 0x29a   : > { %v958_v19 = vor.u32 1.1754944e-38, %v957_v15  ;;  %vm956_vm6 = vcmp.eq.f32.partialorder %v955_v17, 8.507059e+37 }
 0x29e   : > { %v3035_v12 = vpop.eup %3034 }
 0x29f   : > { %v947_v13 = vmul.f32 %v3035_v12, %v945_v11  ;;  %vm952_vm3 = vweird.f32 %v3035_v12 }
 0x2a0   : > { %vm953_vm5 = vmor %vm951_vm4, %vm952_vm3 }
 0x2a1   : > { %v948_v14 = vsub.f32 1.0, %v947_v13 }
 0x2a3   : > { %v949_v16 = vmul.f32 %v3035_v12, %v948_v14 }
 0x2a5   : > { %v950_v18 = vadd.f32 %v3035_v12, %v949_v16 }
 0x2a7   : > { %v954_v20 = vsel %vm953_vm5, %v3035_v12, %v950_v18 }
 0x2a8   : > { %v959_v21 = vsel %vm956_vm6, %v958_v19, %v954_v20 }
 0x2a9   : > { %v960_v22 = vmul.f32 %v3033_v5, %v959_v21 }
 0x2aa   : > { %v1056_v23 = vpop.permute.xlu0 %1055 }
 0x2ab   : > { %2491 = vmatmul.msk.bf16.vlgmr.msrb.gmra.mxu2 %vm915_vm0, %v1056_v23  ;;  %v961_v24 = vpack.c.bf16 %v960_v22, %v960_v22 }
 0x2ad   : > { %2488 = vmatmul.msk.bf16.vlgmr.msrb.gmra.mxu3 %vm936_vm2, %v961_v24 }
 0x2ae   : > { %1142 = vmatpush.bf16.xpose.msrb.mxu3 %v1133_v25 }
 0x2b2   : > { %v1408_v27 = vpop.permute.xlu0 %1407 }
 0x2b3   : > { %v1413_v28 = vsel %vm915_vm0, %v1408_v27, 0 }
 0x2bd   : > { %2489 = vmatmul.msk.bf16.vlgmr.msra.gmra.mxu3 %vm915_vm0, %v984_v54 }
 0x2be   : > { %1282 = vmatpush.bf16.xpose.msra.mxu3 %v1273_v26 }
 0x2cd   : > { %2493 = vmatmul.msk.bf16.vlgmr.msrb.gmra.mxu3 %vm915_vm0, %v1126_v56 }
 0x2ce   : > { %1422 = vmatpush.bf16.xpose.msrb.mxu3 %v1413_v28 }
 0x2dd   : > { %2497 = vmatmul.msk.bf16.vlgmr.msra.gmra.mxu3 %vm915_vm0, %v1266_v61  ;;  %v1221_v55 = vpop.xlane.xlu0 %1220 }
 0x2de   : > { %v1222_v58 = vsub.f32 %v3764_v9, %v1221_v55 }
 0x2e0   : > { %v1223_v60 = vmul.f32 1.442695, %v1222_v58 }
 0x2ed   : > { %2501 = vmatmul.msk.bf16.vlgmr.msrb.gmra.mxu3 %vm915_vm0, %v1406_v29 }
 0x32e   : > { %v1074_v30 = vpop.f32.mrf.mxu2 }
 0x32f   : > { %v1078_v31 = vmul.f32 0.25, %v1074_v30 }
 0x330   : > { %v3777_v32 = vpop.f32.mrf.mxu3 }
 0x331   : > { %v1079_v33 = vsel %vm936_vm2, %v1078_v31, -inf }
 0x332   : > { %1080 = vmax.xlane.f32.xlu1 %v1079_v33 }
 0x336   : > { %v1076_v35 = vpop.f32.mrf.mxu2 }
 0x338   : > { %v980_v36 = vpop.f32.mrf.mxu3 }
 0x33a   : > { %1360 = vmax.xlane.f32.xlu1 %v1359_v37 }
 0x340   : > { %v1003_v38 = vpop.f32.mrf.mxu3 }
 0x341   : > { %v1007_v39 = vmul.f32 0.25, %v1003_v38 }
 0x343   : > { %v1008_v40 = vsel %vm936_vm2, %v1007_v39, -inf }
 0x344   : > { %1009 = vmax.xlane.f32.xlu0 %v1008_v40 }
 0x348   : > { %v1005_v41 = vpop.f32.mrf.mxu3 }
 0x350   : > { %v1144_v43 = vpop.f32.mrf.mxu3 }
 0x351   : > { %v1148_v44 = vmul.f32 0.25, %v1144_v43 }
 0x353   : > { %v1149_v45 = vsel %vm936_vm2, %v1148_v44, -inf }
 0x354   : > { %1150 = vmax.xlane.f32.xlu2 %v1149_v45 }
 0x358   : > { %v1146_v46 = vpop.f32.mrf.mxu3 }
 0x360   : > { %v1284_v47 = vpop.f32.mrf.mxu3 }
 0x361   : > { %v1288_v48 = vmul.f32 0.25, %v1284_v47 }
 0x363   : > { %v1289_v49 = vsel %vm936_vm2, %v1288_v48, -inf }
 0x364   : > { %1290 = vmax.xlane.f32.xlu2 %v1289_v49 }
 0x368   : > { %v1286_v50 = vpop.f32.mrf.mxu3 }
 0x370   : > { %v1424_v51 = vpop.f32.mrf.mxu3 }
 0x371   : > { %v1428_v52 = vmul.f32 0.25, %v1424_v51 }
 0x373   : > { %v1429_v53 = vsel %vm936_vm2, %v1428_v52, -inf }
 0x374   : > { %1430 = vmax.xlane.f32.xlu0 %v1429_v53 }
 0x378   : > { %v1426_v54 = vpop.f32.mrf.mxu3 }
 0x388   : > { %1104 = vrot.lane.b32.xlu0 %v3749_v42, %s3423_s22 }
 0x3a5   : > { %v1081_v56 = vpop.xlane.xlu1 %1080 }
 0x3a6   : > { %v1082_v57 = vsub.f32 %v1078_v31, %v1081_v56 }
 0x3a8   : > { %v1083_v59 = vmul.f32 1.442695, %v1082_v57 }
 0x3aa   : > { %3036 = vpow2.f32 %v1083_v59 }
 0x3ab   : > { %3038 = vpow2.f32 %v1223_v60 }
 0x3ad   : > { %v1361_v14 = vpop.xlane.xlu1 %1360 }
 0x3ae   : > { %v1362_v16 = vsub.f32 %v3780_v34, %v1361_v14 }
 0x3b0   : > { %v3791_v61 = vpop.eup %3036  ;;  %v1363_v17 = vmul.f32 1.442695, %v1362_v16 }
 0x3b1   : > { %v1085_v62 = vsel %vm936_vm2, %v3791_v61, 0.0  ;;  %v3795_v63 = vpop.eup %3038 }
 0x3b2   : > { %1086 = vadd.xlane.f32.xlu1 %v1085_v62  ;;  %v1225_v2 = vsel %vm936_vm2, %v3795_v63, 0.0 }
 0x3b7   : > { %v1010_v0 = vpop.xlane.xlu0 %1009 }
 0x3b8   : > { %v1011_v1 = vsub.f32 %v1007_v39, %v1010_v0 }
 0x3ba   : > { %v1012_v3 = vmul.f32 1.442695, %v1011_v1  ;;  %1226 = vadd.xlane.f32.xlu1 %v1225_v2 }
 0x3bc   : > { %3040 = vpow2.f32 %v1012_v3 }
 0x3c2   : > { %v3799_v4 = vpop.eup %3040 }
 0x3c3   : > { %v1014_v5 = vsel %vm936_vm2, %v3799_v4, 0.0 }
 0x3c4   : > { %1015 = vadd.xlane.f32.xlu2 %v1014_v5 }
 0x3c7   : > { %v1151_v6 = vpop.xlane.xlu2 %1150 }
 0x3c8   : > { %v1152_v7 = vsub.f32 %v1148_v44, %v1151_v6 }
 0x3ca   : > { %v1153_v8 = vmul.f32 1.442695, %v1152_v7 }
 0x3cc   : > { %3042 = vpow2.f32 %v1153_v8 }
 0x3d2   : > { %v3803_v9 = vpop.eup %3042 }
 0x3d3   : > { %1174 = vrot.lane.b32.xlu1 %v3749_v42, %s3425_s17  ;;  %v1155_v10 = vsel %vm936_vm2, %v3803_v9, 0.0 }
 0x3d4   : > { %1156 = vadd.xlane.f32.xlu0 %v1155_v10 }
 0x3d7   : > { %v1291_v11 = vpop.xlane.xlu2 %1290 }
 0x3d8   : > { %v1292_v12 = vsub.f32 %v1288_v48, %v1291_v11 }
 0x3da   : > { %v1293_v13 = vmul.f32 1.442695, %v1292_v12 }
 0x3dc   : > { %1034 = vrot.lane.b32.xlu2 %v3749_v42, %s3424_s28  ;;  %3044 = vpow2.f32 %v1293_v13 }
 0x3dd   : > { %3046 = vpow2.f32 %v1363_v17 }
 0x3e2   : > { %v3814_v18 = vpop.eup %3044 }
 0x3e3   : > { %v1295_v21 = vsel %vm936_vm2, %v3814_v18, 0.0  ;;  %v3819_v23 = vpop.eup %3046 }
 0x3e4   : > { %v1365_v25 = vsel %vm936_vm2, %v3819_v23, 0.0 }
 0x3e7   : > { %v1431_v15 = vpop.xlane.xlu0 %1430 }
 0x3e8   : > { %1244 = vrot.lane.b32.xlu0 %v3749_v42, %s3426_s29  ;;  %v1432_v22 = vsub.f32 %v1428_v52, %v1431_v15 }
 0x3ea   : > { %v1433_v24 = vmul.f32 1.442695, %v1432_v22 }
 0x3ec   : > { %3048 = vpow2.f32 %v1433_v24 }
 0x3f2   : > { %v3823_v26 = vpop.eup %3048 }
 0x3f3   : > { %v1435_v27 = vsel %vm936_vm2, %v3823_v26, 0.0 }
 0x3fa   : > { %v1105_v19 = vpop.permute.xlu0 %1104 }
 0x3fb   : > { %v1110_v20 = vsel %vm965_vm1, %v1105_v19, 0 }
 0x3fc   : > { %1119 = vmatpush.bf16.msra.mxu2 %v1110_v20 }
 0x3fd   : > { %1296 = vadd.xlane.f32.xlu1 %v1295_v21 }
 0x405   : > { %1366 = vadd.xlane.f32.xlu2 %v1365_v25 }
 0x412   : > { %1436 = vadd.xlane.f32.xlu0 %v1435_v27 }
 0x416   : > { %1314 = vrot.lane.b32.xlu1 %v3749_v42, %s3427_s15 }
 0x41e   : > { %1384 = vrot.lane.b32.xlu1 %v3749_v42, %s3428_s16 }
 0x425   : > { %v1087_v28 = vpop.xlane.xlu1 %1086 }
 0x426   : > { %3050 = vrcp.f32 %v1087_v28  ;;  %1454 = vrot.lane.b32.xlu1 %v3749_v42, %s3429_s5  ;;  %v1099_v33 = vand.u32 2147483648, %v1087_v28  ;;  %v1097_v35 = vand.u32 2147483647, %v1087_v28  ;;  %vm1093_vm8 = vweird.f32 %v1087_v28 }
 0x428   : > { %v1100_v37 = vor.u32 1.1754944e-38, %v1099_v33  ;;  %vm1098_vm10 = vcmp.eq.f32.partialorder %v1097_v35, 8.507059e+37 }
 0x42c   : > { %v3051_v29 = vpop.eup %3050 }
 0x42d   : > { %v1089_v30 = vmul.f32 %v3051_v29, %v1087_v28  ;;  %vm1094_vm7 = vweird.f32 %v3051_v29  ;;  %v1227_v41 = vpop.xlane.xlu1 %1226 }
 0x42e   : > { %vm1095_vm9 = vmor %vm1093_vm8, %vm1094_vm7  ;;  %v1239_v6 = vand.u32 2147483648, %v1227_v41  ;;  %vm1233_vm3 = vweird.f32 %v1227_v41  ;;  %v1237_v7 = vand.u32 2147483647, %v1227_v41 }
 0x42f   : > { %v1090_v31 = vsub.f32 1.0, %v1089_v30 }
 0x430   : > { %v1240_v14 = vor.u32 1.1754944e-38, %v1239_v6  ;;  %vm1238_vm6 = vcmp.eq.f32.partialorder %v1237_v7, 8.507059e+37 }
 0x431   : > { %v1091_v34 = vmul.f32 %v3051_v29, %v1090_v31 }
 0x433   : > { %v1092_v36 = vadd.f32 %v3051_v29, %v1091_v34 }
 0x435   : > { %v1096_v38 = vsel %vm1095_vm9, %v3051_v29, %v1092_v36 }
 0x436   : > { %v1101_v39 = vsel %vm1098_vm10, %v1100_v37, %v1096_v38 }
 0x437   : > { %v1102_v40 = vmul.f32 %v3791_v61, %v1101_v39  ;;  %v1016_v43 = vpop.xlane.xlu2 %1015 }
 0x438   : > { %3052 = vrcp.f32 %v1016_v43  ;;  %v1028_v52 = vand.u32 2147483648, %v1016_v43  ;;  %v1026_v53 = vand.u32 2147483647, %v1016_v43  ;;  %vm1022_vm12 = vweird.f32 %v1016_v43 }
 0x439   : > { %v1103_v42 = vpack.c.bf16 %v1102_v40, %v1102_v40  ;;  %3054 = vrcp.f32 %v1227_v41 }
 0x43a   : > { %v1029_v58 = vor.u32 1.1754944e-38, %v1028_v52  ;;  %vm1027_vm14 = vcmp.eq.f32.partialorder %v1026_v53, 8.507059e+37 }
 0x43b   : > { %2492 = vmatmul.msk.bf16.vlgmr.msra.gmra.mxu2 %vm936_vm2, %v1103_v42 }
 0x43e   : > { %v3053_v44 = vpop.eup %3052 }
 0x43f   : > { %v1018_v45 = vmul.f32 %v3053_v44, %v1016_v43  ;;  %v1035_v46 = vpop.permute.xlu2 %1034  ;;  %v3055_v47 = vpop.eup %3054  ;;  %vm1023_vm11 = vweird.f32 %v3053_v44 }
 0x440   : > { %v1040_v48 = vsel %vm965_vm1, %v1035_v46, 0  ;;  %v1229_v50 = vmul.f32 %v3055_v47, %v1227_v41  ;;  %vm1024_vm13 = vmor %vm1022_vm12, %vm1023_vm11  ;;  %vm1234_vm15 = vweird.f32 %v3055_v47 }
 0x441   : > { %v1019_v49 = vsub.f32 1.0, %v1018_v45  ;;  %1049 = vmatpush.bf16.msrb.mxu0 %v1040_v48  ;;  %vm1235_vm4 = vmor %vm1233_vm3, %vm1234_vm15 }
 0x442   : > { %v1230_v57 = vsub.f32 1.0, %v1229_v50 }
 0x443   : > { %v1020_v51 = vmul.f32 %v3053_v44, %v1019_v49 }
 0x444   : > { %v1231_v0 = vmul.f32 %v3055_v47, %v1230_v57 }
 0x445   : > { %v1021_v54 = vadd.f32 %v3053_v44, %v1020_v51  ;;  %v1175_v55 = vpop.permute.xlu1 %1174 }
 0x446   : > { %v1180_v56 = vsel %vm965_vm1, %v1175_v55, 0  ;;  %v1232_v3 = vadd.f32 %v3055_v47, %v1231_v0 }
 0x447   : > { %1189 = vmatpush.bf16.msra.mxu0 %v1180_v56  ;;  %v1157_v59 = vpop.xlane.xlu0 %1156  ;;  %v1025_v60 = vsel %vm1024_vm13, %v3053_v44, %v1021_v54 }
 0x448   : > { %3056 = vrcp.f32 %v1157_v59  ;;  %v1030_v61 = vsel %vm1027_vm14, %v1029_v58, %v1025_v60  ;;  %v1169_v10 = vand.u32 2147483648, %v1157_v59  ;;  %v1236_v11 = vsel %vm1235_vm4, %v3055_v47, %v1232_v3 }
 0x449   : > { %v1031_v62 = vmul.f32 %v3799_v4, %v1030_v61  ;;  %v1167_v13 = vand.u32 2147483647, %v1157_v59  ;;  %vm1163_vm7 = vweird.f32 %v1157_v59  ;;  %v1241_v15 = vsel %vm1238_vm6, %v1240_v14, %v1236_v11 }
 0x44a   : > { %v1170_v16 = vor.u32 1.1754944e-38, %v1169_v10  ;;  %v1242_v20 = vmul.f32 %v3795_v63, %v1241_v15 }
 0x44b   : > { %v1032_v1 = vpack.c.bf16 %v1031_v62, %v1031_v62  ;;  %vm1168_vm9 = vcmp.eq.f32.partialorder %v1167_v13, 8.507059e+37 }
 0x44c   : > { %v1243_v27 = vpack.c.bf16 %v1242_v20, %v1242_v20 }
 0x44d   : > { %2490 = vmatmul.msk.bf16.vlgmr.msrb.gmra.mxu0 %vm936_vm2, %v1032_v1 }
 0x44e   : > { %v3057_v2 = vpop.eup %3056 }
 0x44f   : > { %v1159_v5 = vmul.f32 %v3057_v2, %v1157_v59  ;;  %vm1164_vm5 = vweird.f32 %v3057_v2 }
 0x450   : > { %vm1165_vm8 = vmor %vm1163_vm7, %vm1164_vm5 }
 0x451   : > { %v1160_v8 = vsub.f32 1.0, %v1159_v5 }
 0x453   : > { %v1161_v12 = vmul.f32 %v3057_v2, %v1160_v8 }
 0x455   : > { %v1162_v4 = vadd.f32 %v3057_v2, %v1161_v12 }
 0x457   : > { %v1166_v17 = vsel %vm1165_vm8, %v3057_v2, %v1162_v4 }
 0x458   : > { %v1171_v19 = vsel %vm1168_vm9, %v1170_v16, %v1166_v17  ;;  %vm1508_vm9 = vcmask 523264  }
 0x459   : > { %v1172_v21 = vmul.f32 %v3803_v9, %v1171_v19 }
 0x45a   : > { %v1245_v22 = vpop.permute.xlu0 %1244 }
 0x45b   : > { %v1250_v24 = vsel %vm965_vm1, %v1245_v22, 0  ;;  %v1173_v25 = vpack.c.bf16 %v1172_v21, %v1172_v21  ;;  %v2829_v22 = vld [vmem:[#allocation13 + $0x38] sm:$0xff] }
 0x45c   : > { %1259 = vmatpush.bf16.msrb.mxu2 %v1250_v24  ;;  %1585 = vmatpush.bf16.msrb.mxu1 %v2829_v22  ;;  %v2828_v24 = vld [vmem:[#allocation13 + $0x30] sm:$0xff]  ;;  %v2845_v22 = vld [vmem:[#allocation15 + $0x74] sm:$0xf0] }
 0x45d   : > { %2494 = vmatmul.msk.bf16.vlgmr.msra.gmra.mxu0 %vm936_vm2, %v1173_v25  ;;  %v2827_v25 = vld [vmem:[#allocation13 + $0x28] sm:$0xff] }
 0x45f   : > { %2496 = vmatmul.msk.bf16.vlgmr.msrb.gmra.mxu2 %vm936_vm2, %v1243_v27  ;;  %v2826_v27 = vld [vmem:[#allocation13 + $0x20] sm:$0xff] }
 0x460   : > { %1586 = vmatpush.bf16.msrb.mxu1 %v2828_v24  ;;  %v2843_v24 = vld [vmem:[#allocation15 + $0x6c] sm:$0xf] }
 0x464   : > { %1587 = vmatpush.bf16.msrb.mxu1 %v2827_v25  ;;  %v2598_v25 = vld [vmem:[#allocation15 + $0x78] sm:$0xf0] }
 0x468   : > { %1588 = vmatpush.bf16.msrb.mxu1 %v2826_v27 }
 0x470   : > { %v1297_v28 = vpop.xlane.xlu1 %1296 }
 0x471   : > { %3058 = vrcp.f32 %v1297_v28  ;;  %v1309_v34 = vand.u32 2147483648, %v1297_v28  ;;  %vm1303_vm11 = vweird.f32 %v1297_v28  ;;  %v1307_v36 = vand.u32 2147483647, %v1297_v28 }
 0x473   : > { %v1310_v39 = vor.u32 1.1754944e-38, %v1309_v34  ;;  %vm1308_vm13 = vcmp.eq.f32.partialorder %v1307_v36, 8.507059e+37  ;;  %v2660_v36 = vld [vmem:[#allocation15 + $0xe8] sm:$0xf] }
 0x477   : > { %v3059_v29 = vpop.eup %3058 }
 0x478   : > { %v1299_v30 = vmul.f32 %v3059_v29, %v1297_v28  ;;  %v1367_v31 = vpop.xlane.xlu2 %1366  ;;  %vm1304_vm10 = vweird.f32 %v3059_v29  ;;  %v2825_v28 = vld [vmem:[#allocation13 + $0x18] sm:$0xff] }
 0x479   : > { %3060 = vrcp.f32 %v1367_v31  ;;  %vm1305_vm12 = vmor %vm1303_vm11, %vm1304_vm10  ;;  %v1379_v45 = vand.u32 2147483648, %v1367_v31  ;;  %vm1373_vm15 = vweird.f32 %v1367_v31  ;;  %v1377_v47 = vand.u32 2147483647, %v1367_v31  ;;  %1589 = vmatpush.bf16.msrb.mxu1 %v2825_v28 }
 0x47a   : > { %v1300_v33 = vsub.f32 1.0, %v1299_v30  ;;  %v2823_v30 = vld [vmem:[#allocation13 + $0x8] sm:$0xff]  ;;  %vm1510_vm10 = vcmask 654336   ;;  %vm1512_vm11 = vcmask 785408  }
 0x47b   : > { %v1380_v51 = vor.u32 1.1754944e-38, %v1379_v45  ;;  %vm1378_vm4 = vcmp.eq.f32.partialorder %v1377_v47, 8.507059e+37  ;;  %v2854_v45 = vld [vmem:[#allocation15 + $0xc4] sm:$0xf] }
 0x47c   : > { %v1301_v63 = vmul.f32 %v3059_v29, %v1300_v33  ;;  %v2652_v33 = vld [vmem:[#allocation15 + $0xe0] sm:$0xf] }
 0x47e   : > { %v1302_v9 = vadd.f32 %v3059_v29, %v1301_v63  ;;  %v2860_v63 = vld [vmem:[#allocation15 + $0xec] sm:$0xf0] }
 0x47f   : > { %v3061_v35 = vpop.eup %3060  ;;  %v2653_v34 = vor.u32 %v2860_v63, %v2652_v33  ;;  %v2838_v33 = vld [vmem:[#allocation15 + $0x44] sm:$0xf]  ;;  %v2601_v63 = vor.u32 %v2843_v24, %v2598_v25  ;;  %v2891_v24 = vld [vmem:[#allocation16 + $0xe8] sm:$0xff] }
 0x480   : > { %v1369_v37 = vmul.f32 %v3061_v35, %v1367_v31  ;;  %v1306_v38 = vsel %vm1305_vm12, %v3059_v29, %v1302_v9  ;;  %vm1374_vm14 = vweird.f32 %v3061_v35  ;;  %v2824_v29 = vld [vmem:[#allocation13 + $0x10] sm:$0xff]  ;;  %v2822_v31 = vld [vmem:[#allocation13] sm:$0xff]  ;;  %vm1514_vm12 = vcmask 916480   ;;  %v2867_v25 = vld [vmem:[#allocation16 + $0x28] sm:$0xff] }
 0x481   : > { %v1311_v41 = vsel %vm1308_vm13, %v1310_v39, %v1306_v38  ;;  %vm1375_vm3 = vmor %vm1373_vm15, %vm1374_vm14  ;;  %1590 = vmatpush.bf16.msrb.mxu1 %v2824_v29  ;;  %v2858_v9 = vld [vmem:[#allocation15 + $0xe4] sm:$0xf] }
 0x482   : > { %v1370_v40 = vsub.f32 1.0, %v1369_v37  ;;  %v1312_v46 = vmul.f32 %v3814_v18, %v1311_v41  ;;  %v2861_v37 = vld [vmem:[#allocation15 + $0xf4] sm:$0xf0]  ;;  %v2662_v41 = vld [vmem:[#allocation15 + $0xf8] sm:$0xf0] }
 0x483   : > { %v2661_v39 = vor.u32 %v2861_v37, %v2660_v36  ;;  %v2839_v37 = vld [vmem:[#allocation15 + $0x4c] sm:$0xf] }
 0x484   : > { %v1371_v43 = vmul.f32 %v3061_v35, %v1370_v40  ;;  %v1313_v52 = vpack.c.bf16 %v1312_v46, %v1312_v46  ;;  %v2859_v40 = vld [vmem:[#allocation15 + $0xec] sm:$0xf]  ;;  %v2638_v46 = vld [vmem:[#allocation15 + $0xd0] sm:$0xf0] }
 0x485   : > { %v1437_v42 = vpop.xlane.xlu0 %1436  ;;  %1591 = vmatpush.bf16.msrb.mxu1 %v2823_v30  ;;  %v2572_v30 = vld [vmem:[#allocation15 + $0x40] sm:$0xf] }
 0x486   : > { %v1372_v44 = vadd.f32 %v3061_v35, %v1371_v43  ;;  %3062 = vrcp.f32 %v1437_v42  ;;  %v1449_v18 = vand.u32 2147483648, %v1437_v42  ;;  %v1447_v60 = vand.u32 2147483647, %v1437_v42  ;;  %v2636_v43 = vld [vmem:[#allocation15 + $0xc0] sm:$0xf] }
 0x487   : > { %vm1443_vm6 = vweird.f32 %v1437_v42 }
 0x488   : > { %v1315_v48 = vpop.permute.xlu1 %1314  ;;  %v1376_v49 = vsel %vm1375_vm3, %v3061_v35, %v1372_v44  ;;  %v1450_v1 = vor.u32 1.1754944e-38, %v1449_v18  ;;  %vm1448_vm8 = vcmp.eq.f32.partialorder %v1447_v60, 8.507059e+37  ;;  %v2654_v35 = vld [vmem:[#allocation15 + $0xf0] sm:$0xf0]  ;;  %v2856_v44 = vld [vmem:[#allocation15 + $0xcc] sm:$0xf0] }
 0x489   : > { %v1320_v50 = vsel %vm965_vm1, %v1315_v48, 0  ;;  %v1381_v54 = vsel %vm1378_vm4, %v1380_v51, %v1376_v49  ;;  %1592 = vmatpush.bf16.msrb.mxu1 %v2822_v31  ;;  %v2657_v38 = vor.u32 %v2858_v9, %v2654_v35  ;;  %v2637_v48 = vor.u32 %v2856_v44, %v2636_v43  ;;  %v2857_v51 = vld [vmem:[#allocation15 + $0xd4] sm:$0xf0]  ;;  %v2850_v18 = vld [vmem:[#allocation15 + $0xa4] sm:$0xf] }
 0x48a   : > { %1329 = vmatpush.bf16.msrb.mxu0 %v1320_v50  ;;  %v1382_v56 = vmul.f32 %v3819_v23, %v1381_v54  ;;  %v2641_v49 = vor.u32 %v2854_v45, %v2638_v46  ;;  %v2644_v50 = vld [vmem:[#allocation15 + $0xc8] sm:$0xf]  ;;  %v2646_v54 = vld [vmem:[#allocation15 + $0xd8] sm:$0xf0]  ;;  %v2840_v31 = vld [vmem:[#allocation15 + $0x4c] sm:$0xf0] }
 0x48b   : > { %1823 = vmatpush.bf16.msra.mxu3 %v2657_v38  ;;  %v2574_v9 = vld [vmem:[#allocation15 + $0x50] sm:$0xf0]  ;;  %v2841_v35 = vld [vmem:[#allocation15 + $0x54] sm:$0xf0]  ;;  %v2582_v38 = vld [vmem:[#allocation15 + $0x58] sm:$0xf0] }
 0x48c   : > { %v3063_v53 = vpop.eup %3062  ;;  %v1383_v0 = vpack.c.bf16 %v1382_v56, %v1382_v56  ;;  %v2852_v56 = vld [vmem:[#allocation15 + $0xac] sm:$0xf0]  ;;  %v2585_v45 = vor.u32 %v2839_v37, %v2582_v38  ;;  %v3030_v37 = vld [vmem:[%s3925_s10] ss:$0 sm:$0xff]  ;;  %v1604_v38 = vstv %s2535_s27  ;;  %s2201_s27 = sshll.u32 %s663_s7, 4  ;;  %s2202_s27 = int_to_ptr.vmem [resolvable:$true] %s2201_s27 }
 0x48d   : > { %v1439_v55 = vmul.f32 %v3063_v53, %v1437_v42  ;;  %2498 = vmatmul.msk.bf16.vlgmr.msrb.gmra.mxu0 %vm936_vm2, %v1313_v52  ;;  %vm1444_vm5 = vweird.f32 %v3063_v53  ;;  %v2665_v42 = vor.u32 %v2859_v40, %v2662_v41  ;;  %v2855_v52 = vld [vmem:[#allocation15 + $0xcc] sm:$0xf]  ;;  %v2577_v41 = vor.u32 %v2838_v33, %v2574_v9  ;;  %v2881_v33 = vld [vmem:[#allocation16 + $0x98] sm:$0xff] }
 0x48e   : > { %vm1445_vm7 = vmor %vm1443_vm6, %vm1444_vm5  ;;  %v2865_v9 = vld [vmem:[#allocation16 + $0x18] sm:$0xff] }
 0x48f   : > { %v1440_v57 = vsub.f32 1.0, %v1439_v55  ;;  %1849 = vmatpush.bf16.msra.mxu1 %v2665_v42  ;;  %v2620_v55 = vld [vmem:[#allocation15 + $0xa0] sm:$0xf]  ;;  %1824 = vmatpush.bf16.msra.mxu3 %v2641_v49 }
 0x490   : > { %v1385_v58 = vpop.permute.xlu1 %1384  ;;  %v2621_v60 = vor.u32 %v2852_v56, %v2620_v55  ;;  %v2556_v55 = vld [vmem:[#allocation15 + $0x20] sm:$0xf]  ;;  %v2836_v56 = vld [vmem:[#allocation15 + $0x2c] sm:$0xf0] }
 0x491   : > { %v1441_v59 = vmul.f32 %v3063_v53, %v1440_v57  ;;  %v1390_v61 = vsel %vm965_vm1, %v1385_v58, 0  ;;  %v2649_v57 = vor.u32 %v2855_v52, %v2646_v54  ;;  %v2622_v58 = vld [vmem:[#allocation15 + $0xb0] sm:$0xf0] }
 0x492   : > { %1399 = vmatpush.bf16.msra.mxu2 %v1390_v61  ;;  %v2853_v61 = vld [vmem:[#allocation15 + $0xb4] sm:$0xf0] }
 0x493   : > { %v1442_v62 = vadd.f32 %v3063_v53, %v1441_v59  ;;  %v2628_v59 = vld [vmem:[#allocation15 + $0xa8] sm:$0xf]  ;;  %1850 = vmatpush.bf16.msra.mxu1 %v2649_v57  ;;  %v2834_v57 = vld [vmem:[#allocation15 + $0x24] sm:$0xf] }
 0x495   : > { %v1446_v2 = vsel %vm1445_vm7, %v3063_v53, %v1442_v62  ;;  %2500 = vmatmul.msk.bf16.vlgmr.msra.gmra.mxu2 %vm936_vm2, %v1383_v0  ;;  %v2645_v53 = vor.u32 %v2857_v51, %v2644_v50  ;;  %v2851_v62 = vld [vmem:[#allocation15 + $0xac] sm:$0xf]  ;;  %v2630_v0 = vld [vmem:[#allocation15 + $0xb8] sm:$0xf0] }
 0x496   : > { %v1451_v3 = vsel %vm1448_vm8, %v1450_v1, %v1446_v2  ;;  %1810 = vmatpush.bf16.msrb.mxu2 %v2653_v34  ;;  %v2625_v1 = vor.u32 %v2850_v18, %v2622_v58  ;;  %v2629_v2 = vor.u32 %v2853_v61, %v2628_v59  ;;  %v2580_v34 = vld [vmem:[#allocation15 + $0x48] sm:$0xf]  ;;  %v2558_v18 = vld [vmem:[#allocation15 + $0x30] sm:$0xf0]  ;;  %v2837_v59 = vld [vmem:[#allocation15 + $0x34] sm:$0xf0] }
 0x497   : > { %v1452_v23 = vmul.f32 %v3823_v26, %v1451_v3  ;;  %v2604_v3 = vld [vmem:[#allocation15 + $0x80] sm:$0xf]  ;;  %v2581_v43 = vor.u32 %v2841_v35, %v2580_v34  ;;  %v2564_v58 = vld [vmem:[#allocation15 + $0x28] sm:$0xf]  ;;  %v2873_v34 = vld [vmem:[#allocation16 + $0x58] sm:$0xff] }
 0x498   : > { %v1455_v5 = vpop.permute.xlu1 %1454  ;;  %1825 = vmatpush.bf16.msra.mxu3 %v2625_v1  ;;  %v2565_v61 = vor.u32 %v2837_v59, %v2564_v58  ;;  %v2880_v35 = vld [vmem:[#allocation16 + $0x90] sm:$0xff] }
 0x499   : > { %v1460_v6 = vsel %vm965_vm1, %v1455_v5, 0  ;;  %v1453_v7 = vpack.c.bf16 %v1452_v23, %v1452_v23  ;;  %v2848_v23 = vld [vmem:[#allocation15 + $0x8c] sm:$0xf0]  ;;  %v2846_v5 = vld [vmem:[#allocation15 + $0x84] sm:$0xf]  ;;  %vm1504_vm1 = vcmask 261120  }
 0x49a   : > { %1469 = vmatpush.bf16.msra.mxu0 %v1460_v6  ;;  %1811 = vmatpush.bf16.msrb.mxu2 %v2637_v48  ;;  %v2633_v6 = vor.u32 %v2851_v62, %v2630_v0  ;;  %v2835_v62 = vld [vmem:[#allocation15 + $0x2c] sm:$0xf]  ;;  %v2566_v0 = vld [vmem:[#allocation15 + $0x38] sm:$0xf0] }
 0x49b   : > { %v2569_v1 = vor.u32 %v2835_v62, %v2566_v0 }
 0x49c   : > { %1851 = vmatpush.bf16.msra.mxu1 %v2633_v6  ;;  %v2542_v6 = vld [vmem:[#allocation15 + $0x10] sm:$0xf0] }
 0x49d   : > { %2502 = vmatmul.msk.bf16.vlgmr.msra.gmra.mxu0 %vm936_vm2, %v1453_v7  ;;  %v2606_v7 = vld [vmem:[#allocation15 + $0x90] sm:$0xf0]  ;;  %vm1506_vm2 = vcmask 392192  }
 0x49e   : > { %1836 = vmatpush.bf16.msrb.mxu0 %v2661_v39  ;;  %1812 = vmatpush.bf16.msrb.mxu2 %v2621_v60  ;;  %v2573_v39 = vor.u32 %v2840_v31, %v2572_v30  ;;  %v2561_v60 = vor.u32 %v2834_v57, %v2558_v18  ;;  %v2866_v30 = vld [vmem:[#allocation16 + $0x20] sm:$0xff] }
 0x49f   : > { %v2874_v31 = vld [vmem:[#allocation16 + $0x60] sm:$0xff] }
 0x4a0   : > { %v2870_v57 = vld [vmem:[#allocation16 + $0x40] sm:$0xff] }
 0x4a2   : > { %1837 = vmatpush.bf16.msrb.mxu0 %v2645_v53 }
 0x4a6   : > { %1838 = vmatpush.bf16.msrb.mxu0 %v2629_v2  ;;  %v2540_v2 = vld [vmem:[#allocation15] sm:$0xf] }
 0x4be   : > { %v1121_v8 = vpop.f32.mrf.mxu2 }
 0x4bf   : > { %1480 = vrot.lane.b32.xlu1 %v1121_v8, %s3428_s16  ;;  %v2612_v8 = vld [vmem:[#allocation15 + $0x88] sm:$0xf] }
 0x4c6   : > { %v1123_v10 = vpop.f32.mrf.mxu2 }
 0x4c7   : > { %v2849_v10 = vld [vmem:[#allocation15 + $0x94] sm:$0xf0] }
 0x4ca   : > { %v1051_v11 = vpop.f32.mrf.mxu0 }
 0x4cb   : > { %1476 = vrot.lane.b32.xlu2 %v1051_v11, %s3429_s5  ;;  %v2847_v11 = vld [vmem:[#allocation15 + $0x8c] sm:$0xf]  ;;  %s3966_s5 = sld [smem:[#allocation40_spill]] }
 0x4d1   : > { %s3340_s20 = scalar_lea.hbm %s3966_s5, 16 }
 0x4d2   : > { %v1053_v12 = vpop.f32.mrf.mxu0 }
 0x4d3   : > { %v2614_v12 = vld [vmem:[#allocation15 + $0x98] sm:$0xf0] }
 0x4da   : > { %v1191_v13 = vpop.f32.mrf.mxu0 }
 0x4db   : > { %1484 = vrot.lane.b32.xlu1 %v1191_v13, %s3427_s15  ;;  %v2605_v13 = vor.u32 %v2848_v23, %v2604_v3  ;;  %v2832_v3 = vld [vmem:[#allocation15 + $0xc] sm:$0xf0]  ;;  %v2830_v23 = vld [vmem:[#allocation15 + $0x4] sm:$0xf] }
 0x4dd   : > { %1813 = vmatpush.bf16.msrb.mxu2 %v2605_v13  ;;  %v2550_v13 = vld [vmem:[#allocation15 + $0x18] sm:$0xf0] }
 0x4e2   : > { %v1261_v14 = vpop.f32.mrf.mxu2  ;;  %v1193_v26 = vpop.f32.mrf.mxu0 }
 0x4e3   : > { %1488 = vrot.lane.b32.xlu0 %v1261_v14, %s3426_s29  ;;  %v2609_v26 = vor.u32 %v2846_v5, %v2606_v7  ;;  %v2541_v5 = vor.u32 %v2832_v3, %v2540_v2  ;;  %v2548_v7 = vld [vmem:[#allocation15 + $0x8] sm:$0xf]  ;;  %s2795_s29 = sshll.u32 %s3534_s25, 3  ;;  %s2189_s25 = scalar_lea.sflag [#allocation4], %s3680_s13 }
 0x4e4   : > { %s2199_s9 = scalar_lea.hbm %s3966_s5, %s2795_s29 }
 0x4e5   : > { %1826 = vmatpush.bf16.msra.mxu3 %v2609_v26  ;;  %v2885_v26 = vld [vmem:[#allocation16 + $0xb8] sm:$0xff] }
 0x4ea   : > { %v1263_v4 = vpop.f32.mrf.mxu2 }
 0x4eb   : > { %v2613_v4 = vor.u32 %v2849_v10, %v2612_v8  ;;  %v2833_v8 = vld [vmem:[#allocation15 + $0x14] sm:$0xf0]  ;;  %v2545_v10 = vor.u32 %v2830_v23, %v2542_v6 }
 0x4ed   : > { %1839 = vmatpush.bf16.msrb.mxu0 %v2613_v4  ;;  %v2893_v4 = vld [vmem:[#allocation16 + $0xf8] sm:$0xff] }
 0x50a   : > { %v1331_v15 = vpop.f32.mrf.mxu0 }
 0x50b   : > { %1492 = vrot.lane.b32.xlu1 %v1331_v15, %s3425_s17  ;;  %v2588_v15 = vld [vmem:[#allocation15 + $0x60] sm:$0xf]  ;;  %s2537_s17 = sld [smem:[#allocation2 + $0x3]] }
 0x512   : > { %v1333_v16 = vpop.f32.mrf.mxu0 }
 0x513   : > { %v2844_v16 = vld [vmem:[#allocation15 + $0x6c] sm:$0xf0] }
 0x514   : > { %v2589_v27 = vor.u32 %v2844_v16, %v2588_v15  ;;  %v2869_v15 = vld [vmem:[#allocation16 + $0x38] sm:$0xff] }
 0x515   : > { %v2877_v16 = vld [vmem:[#allocation16 + $0x78] sm:$0xff] }
 0x516   : > { %1814 = vmatpush.bf16.msrb.mxu2 %v2589_v27  ;;  %v2875_v27 = vld [vmem:[#allocation16 + $0x68] sm:$0xff] }
 0x518   : > { %v1401_v17 = vpop.f32.mrf.mxu2 }
 0x519   : > { %1496 = vrot.lane.b32.xlu2 %v1401_v17, %s3423_s22  ;;  %v2842_v17 = vld [vmem:[#allocation15 + $0x64] sm:$0xf] }
 0x51a   : > { %v1471_v19 = vpop.f32.mrf.mxu0  ;;  %1815 = vmatpush.bf16.msrb.mxu2 %v2573_v39 }
 0x51b   : > { %1500 = vrot.lane.b32.xlu1 %v1471_v19, %s3424_s28  ;;  %v2617_v19 = vor.u32 %v2847_v11, %v2614_v12  ;;  %v2549_v11 = vor.u32 %v2833_v8, %v2548_v7  ;;  %v2831_v12 = vld [vmem:[#allocation15 + $0xc] sm:$0xf]  ;;  %s3965_s28 = sld [smem:[#allocation39_spill]] }
 0x51d   : > { %1852 = vmatpush.bf16.msra.mxu1 %v2617_v19  ;;  %v2892_v19 = vld [vmem:[#allocation16 + $0xf0] sm:$0xff] }
 0x520   : > { %v1403_v20 = vpop.f32.mrf.mxu2 }
 0x521   : > { %v2590_v20 = vld [vmem:[#allocation15 + $0x70] sm:$0xf0]  ;;  %1853 = vmatpush.bf16.msra.mxu1 %v2601_v63  ;;  %v2889_v63 = vld [vmem:[#allocation16 + $0xd8] sm:$0xff] }
 0x522   : > { %v1473_v21 = vpop.f32.mrf.mxu0  ;;  %v2593_v28 = vor.u32 %v2842_v17, %v2590_v20  ;;  %v2884_v17 = vld [vmem:[#allocation16 + $0xb0] sm:$0xff] }
 0x523   : > { %v2596_v21 = vld [vmem:[#allocation15 + $0x68] sm:$0xf]  ;;  %v2868_v20 = vld [vmem:[#allocation16 + $0x30] sm:$0xff] }
 0x524   : > { %v2597_v29 = vor.u32 %v2845_v22, %v2596_v21  ;;  %1827 = vmatpush.bf16.msra.mxu3 %v2593_v28  ;;  %v2876_v21 = vld [vmem:[#allocation16 + $0x70] sm:$0xff]  ;;  %v2883_v22 = vld [vmem:[#allocation16 + $0xa8] sm:$0xff]  ;;  %v2882_v28 = vld [vmem:[#allocation16 + $0xa0] sm:$0xff] }
 0x525   : > { %v1477_v36 = vpop.permute.xlu2 %1476  ;;  %1854 = vmatpush.bf16.msra.mxu1 %v2585_v45 }
 0x526   : > { %1840 = vmatpush.bf16.msrb.mxu0 %v2597_v29  ;;  %v1503_v42 = vsel %vm915_vm0, %v3777_v32, %v1477_v36  ;;  %v2890_v29 = vld [vmem:[#allocation16 + $0xe0] sm:$0xff]  ;;  %v2888_v36 = vld [vmem:[#allocation16 + $0xd0] sm:$0xff] }
 0x528   : > { %1828 = vmatpush.bf16.msra.mxu3 %v2577_v41  ;;  %v3064_v41 = vld [vmem:[%s580_s24] sm:$0xff] }
 0x529   : > { %1855 = vmatpush.bf16.msra.mxu1 %v2569_v1 }
 0x52a   : > { %1841 = vmatpush.bf16.msrb.mxu0 %v2581_v43  ;;  %v1605_v43 = vmul.f32 %v3064_v41, %v1604_v38 }
 0x52c   : > { %1829 = vmatpush.bf16.msra.mxu3 %v2561_v60 }
 0x52e   : > { %1842 = vmatpush.bf16.msrb.mxu0 %v2565_v61 }
 0x530   : > { %1830 = vmatpush.bf16.msra.mxu3 %v2545_v10 }
 0x531   : > { %v3860_v47 = vpop.permute.xlu1 %1480 }
 0x532   : > { %v1505_v46 = vsel %vm1504_vm1, %v1503_v42, %v3860_v47  ;;  %v2557_v47 = vor.u32 %v2836_v56, %v2556_v55  ;;  %1843 = vmatpush.bf16.msrb.mxu0 %v2549_v11  ;;  %v2871_v55 = vld [vmem:[#allocation16 + $0x48] sm:$0xff]  ;;  %v2862_v56 = vld [vmem:[#allocation16] sm:$0xff] }
 0x534   : > { %1816 = vmatpush.bf16.msrb.mxu2 %v2557_v47  ;;  %2143 = vmatpush.bf16.msrb.mxu3 %v2877_v16  ;;  %v1640_v47 = vld [vmem:[%s3964_s0] sm:$0xf] }
 0x535   : > { %v1644_v18 = vperm.slane %v1640_v47, 2  ;;  %v1645_v58 = vperm.slane %v1640_v47, 3  ;;  %v1642_v0 = vperm.slane %v1640_v47, 0  ;;  %v1643_v1 = vperm.slane %v1640_v47, 1 }
 0x536   : > { %2156 = vmatpush.bf16.msra.mxu0 %v2885_v26 }
 0x538   : > { %1817 = vmatpush.bf16.msrb.mxu2 %v2541_v5  ;;  %2144 = vmatpush.bf16.msrb.mxu3 %v2876_v21 }
 0x53a   : > { %2157 = vmatpush.bf16.msra.mxu0 %v2884_v17 }
 0x53c   : > { %2130 = vmatpush.bf16.msra.mxu2 %v2869_v15  ;;  %2145 = vmatpush.bf16.msrb.mxu3 %v2875_v27 }
 0x53e   : > { %2158 = vmatpush.bf16.msra.mxu0 %v2883_v22  ;;  %v3031_v22 = vld [vmem:[%s3965_s28] ss:$0 sm:$0xff] }
 0x540   : > { %2131 = vmatpush.bf16.msra.mxu2 %v2868_v20  ;;  %2146 = vmatpush.bf16.msrb.mxu3 %v2874_v31  ;;  %v2184_v31 = vstv %s2537_s17 }
 0x542   : > { %2159 = vmatpush.bf16.msra.mxu0 %v2882_v28 }
 0x544   : > { %2132 = vmatpush.bf16.msra.mxu2 %v2867_v25  ;;  %2147 = vmatpush.bf16.msrb.mxu3 %v2873_v34 }
 0x546   : > { %2160 = vmatpush.bf16.msra.mxu0 %v2881_v33 }
 0x548   : > { %2133 = vmatpush.bf16.msra.mxu2 %v2866_v30  ;;  %v2182_v30 = vstv %s2536_s30 }
 0x54a   : > { %2161 = vmatpush.bf16.msra.mxu0 %v2880_v35 }
 0x54c   : > { %2134 = vmatpush.bf16.msra.mxu2 %v2865_v9 }
 0x54d   : > { %v1485_v14 = vpop.permute.xlu1 %1484 }
 0x54e   : > { %v1507_v48 = vsel %vm1506_vm2, %v1505_v46, %v1485_v14  ;;  %v2553_v14 = vor.u32 %v2831_v12, %v2550_v13 }
 0x550   : > { %1856 = vmatpush.bf16.msra.mxu1 %v2553_v14 }
 0x555   : > { %v1489_v44 = vpop.permute.xlu0 %1488 }
 0x556   : > { %v1509_v49 = vsel %vm1508_vm9, %v1507_v48, %v1489_v44 }
 0x573   : > { %v1497_v51 = vpop.permute.xlu2 %1496 }
 0x57d   : > { %v1493_v40 = vpop.permute.xlu1 %1492 }
 0x57e   : > { %v1511_v50 = vsel %vm1510_vm10, %v1509_v49, %v1493_v40  ;;  %v1602_v40 = vstv %s1598_s21  ;;  %v2879_v49 = vld [vmem:[#allocation16 + $0x88] sm:$0xff]  ;;  %s2203_s21 = sshll.u32 %s2199_s9, 4  ;;  %s2204_s21 = int_to_ptr.hbm [resolvable:$true] %s2203_s21 }
 0x57f   : > { %v1513_v53 = vsel %vm1512_vm11, %v1511_v50, %v1497_v51  ;;  %v2887_v50 = vld [vmem:[#allocation16 + $0xc8] sm:$0xff]  ;;  %2162 = vmatpush.bf16.msra.mxu0 %v2879_v49  ;;  %v2864_v51 = vld [vmem:[#allocation16 + $0x10] sm:$0xff]  ;;  %s3334_s26 = sshra.s32 %s2204_s21, 4  ;;  %s3335_s26 = int_to_ptr.hbm [resolvable:$true] %s3334_s26 }
 0x580   : > { %2135 = vmatpush.bf16.msra.mxu2 %v2864_v51  ;;  %s3336_s3 = scalar_lea.hbm %s3335_s26, 8  ;;  %p3341_p7 = scmp.lt.s32.totalorder %s3335_s26, %s3966_s5 }
 0x581   : > { %p3337_p1 = scmp.ne.s32.totalorder %s3335_s26, %s3336_s3  ;;  %p3342_p9 = scmp.lt.s32.totalorder %s3340_s20, %s3336_s3 }
 0x583   : > { %p3338_p3 = pnand %p3337_p1, %p3625_p0  ;;  %p3343_p8 = por %p3342_p9, %p3341_p7 }
 0x585   : > { %p3339_p13 = pneg %p3338_p3 }
 0x587   : > { %p3344_p10 = pnand %p3343_p8, %p3339_p13 }
 0x58d   : > { %v1501_v52 = vpop.permute.xlu1 %1500 }
 0x58e   : > { %v1515_v32 = vsel %vm1514_vm12, %v1513_v53, %v1501_v52  ;;  %v2872_v52 = vld [vmem:[#allocation16 + $0x50] sm:$0xff]  ;;  %v2878_v53 = vld [vmem:[#allocation16 + $0x80] sm:$0xff] }
 0x58f   : > { %v1516_v54 = vpack.c.bf16 %v1515_v32, %v1515_v32  ;;  %2148 = vmatpush.bf16.msrb.mxu3 %v2872_v52  ;;  %v2886_v32 = vld [vmem:[#allocation16 + $0xc0] sm:$0xff]  ;;  %2163 = vmatpush.bf16.msra.mxu0 %v2878_v53 }
 0x591   : > { %1593 = vmatmul.bf16.vlgmr.msrb.gmra.mxu1 %v1516_v54  ;;  %v2863_v54 = vld [vmem:[#allocation16 + $0x8] sm:$0xff] }
 0x592   : > { %2169 = vmatpush.bf16.msrb.mxu1 %v2893_v4  ;;  %2136 = vmatpush.bf16.msra.mxu2 %v2863_v54 }
 0x593   : > { %2149 = vmatpush.bf16.msrb.mxu3 %v2871_v55 }
 0x596   : > { %2170 = vmatpush.bf16.msrb.mxu1 %v2892_v19  ;;  %2137 = vmatpush.bf16.msra.mxu2 %v2862_v56 }
 0x597   : > { %2150 = vmatpush.bf16.msrb.mxu3 %v2870_v57 }
 0x59a   : > { %2171 = vmatpush.bf16.msrb.mxu1 %v2891_v24 }
 0x59e   : > { %2172 = vmatpush.bf16.msrb.mxu1 %v2890_v29 }
 0x5a2   : > { %2173 = vmatpush.bf16.msrb.mxu1 %v2889_v63 }
 0x5a6   : > { %2174 = vmatpush.bf16.msrb.mxu1 %v2888_v36 }
 0x5aa   : > { %2175 = vmatpush.bf16.msrb.mxu1 %v2887_v50 }
 0x5ae   : > { %2176 = vmatpush.bf16.msrb.mxu1 %v2886_v32 }
 0x60e   : > { %v1594_v39 = vpop.f32.mrf.mxu1 }
 0x60f   : > { %v1595_v42 = vadd.f32 %v3030_v37, %v1594_v39 }
 0x611   : > { %v1603_v44 = vmul.f32 %v1602_v40, %v1595_v42 }
 0x613   : > { %v3870_v45 = vadd.f32 %v1605_v43, %v1603_v44 }
 0x615   : > { %v1607_v46 = vpack.c.bf16 %v3870_v45, %v3870_v45  ;;  %v2183_v34 = vmul.f32 %v2182_v30, %v3870_v45 }
 0x616   : > { %v1596_v48 = vpop.f32.mrf.mxu1 }
 0x617   : > { %1818 = vmatmul.bf16.vlgmr.msrb.gmra.mxu2 %v1607_v46  ;;  %1831 = vmatmul.bf16.vlgmr.msra.gmra.mxu3 %v1607_v46 }
 0x618   : > { %1844 = vmatmul.bf16.vlgmr.msrb.gmra.mxu0 %v1607_v46  ;;  %1857 = vmatmul.bf16.vlgmr.msra.gmra.mxu1 %v1607_v46 }
 0x695   : > { %v1845_v59 = vpop.f32.mrf.mxu0  ;;  %v1858_v60 = vpop.f32.mrf.mxu1 }
 0x696   : > { %v1846_v61 = vadd.f32 %v1845_v59, %v1644_v18  ;;  %v1859_v62 = vadd.f32 %v1858_v60, %v1645_v58 }
 0x698   : > { %v1864_v2 = vmax.f32 %v1846_v61, 0.0  ;;  %v1865_v3 = vmax.f32 %v1859_v62, 0.0 }
 0x69a   : > { %v1868_v23 = vpack.c.bf16 %v1864_v2, %v1864_v2  ;;  %v1869_v5 = vpack.c.bf16 %v1865_v3, %v1865_v3  ;;  %v1819_v6 = vpop.f32.mrf.mxu2  ;;  %v1832_v7 = vpop.f32.mrf.mxu3 }
 0x69b   : > { %v1820_v8 = vadd.f32 %v1819_v6, %v1642_v0  ;;  %v1833_v10 = vadd.f32 %v1832_v7, %v1643_v1 }
 0x69c   : > { %2164 = vmatmul.bf16.vlgmr.msra.gmra.mxu0 %v1868_v23  ;;  %2177 = vmatmul.bf16.vlgmr.msrb.gmra.mxu1 %v1869_v5 }
 0x69d   : > { %v1862_v11 = vmax.f32 %v1820_v8, 0.0  ;;  %v1863_v12 = vmax.f32 %v1833_v10, 0.0  ;;  %v1847_v13 = vpop.f32.mrf.mxu0  ;;  %v1860_v14 = vpop.f32.mrf.mxu1 }
 0x69f   : > { %v1866_v26 = vpack.c.bf16 %v1862_v11, %v1862_v11  ;;  %v1867_v4 = vpack.c.bf16 %v1863_v12, %v1863_v12 }
 0x6a1   : > { %2138 = vmatmul.bf16.vlgmr.msra.gmra.mxu2 %v1866_v26  ;;  %2151 = vmatmul.bf16.vlgmr.msrb.gmra.mxu3 %v1867_v4 }
 0x6a2   : > { %v1821_v15 = vpop.f32.mrf.mxu2  ;;  %v1834_v16 = vpop.f32.mrf.mxu3 }
 0x719   : > { %v2165_v17 = vpop.f32.mrf.mxu0  ;;  %v2178_v19 = vpop.f32.mrf.mxu1 }
 0x721   : > { %v2167_v20 = vpop.f32.mrf.mxu0  ;;  %v2180_v21 = vpop.f32.mrf.mxu1 }
 0x724   : > { %v2139_v24 = vpop.f32.mrf.mxu2  ;;  %v2152_v25 = vpop.f32.mrf.mxu3 }
 0x725   : > { %v2140_v27 = vadd.f32 %v3031_v22, %v2139_v24 }
 0x727   : > { %v2153_v28 = vadd.f32 %v2152_v25, %v2140_v27 }
 0x729   : > { %v2166_v29 = vadd.f32 %v2165_v17, %v2153_v28 }
 0x72b   : > { %v2179_v33 = vadd.f32 %v2178_v19, %v2166_v29 }
 0x72c   : > { %v2141_v63 = vpop.f32.mrf.mxu2  ;;  %v2154_v9 = vpop.f32.mrf.mxu3 }
 0x72d   : > { %v2185_v35 = vmul.f32 %v2184_v31, %v2179_v33 }
 0x72f   : > { %v2186_v36 = vadd.f32 %v2185_v35, %v2183_v34 }
 0x731   : > { %2187 = vst [vmem:[%s663_s7] sm:$0xff] %v2186_v36 }
 0x732   : > { %3347 = shalt.err (!%p3344_p10)
}
 0x733   : > { %2926 = dma.vmem_to_hbm [thread:$0]  (%p3625_p0), %s2202_s27, 128, %s2204_s21, %s2189_s25  }
 0x734 PF: > { %s3967_s13 = sld [smem:[#allocation28_spill]]  ;;  %s2215_s11 = sand.u32 1, %s3398_s18  }
 0x735   : > { %s2216_s22 = scalar_lea.sflag [#allocation4], %s2215_s11 }
 0x73a   : > { %p3968_p12 = scmp.ge.s32.totalorder %s3967_s13, 2 }
 0x73c   : > { %p2958_p5 = pnand %p3968_p12, %p3631_p6 }
 0x73e   : > { %p2959_p11 = pneg %p2958_p5 }
 0x740   : > { %3393 = dma.done.wait (%p2959_p11), %s2216_s22, 128  }
 0x741   : > { %3395 = vsyncadd (%p2959_p11), %s2216_s22, 4294967168  ;;  %s3969_s21 = sld [smem:[#allocation29_spill]]  ;;  %s3972_s18 = smov %s3402_s19 }
 0x742   : > { %s3970_s28 = sld [smem:[#allocation27_spill]] }
 0x743   : > { %s3971_s20 = sld [smem:[#allocation30_spill]] }
 0x747   : > { %p35_p2 = scmp.ge.s32.totalorder %s3969_s21, 4  }
 0x748   : > { %s3973_s19 = smov %s3970_s28 }
 0x749   :  { %37 = sbr.rel (!%p35_p2) target bundleno = 22 (0x16), region = 167 }
 0x74e   :  { %2222 = vsyncpa [#allocation3], 1 }
 0x74f   :  { %2224 = vsyncpa [#allocation3 + $0x1], 1 }
 0x750   :  { %2225 = vsyncpa [#allocation8], 1 }
 0x751   :  { %2227 = vsyncpa [#allocation8 + $0x1], 1 }
 0x752   :  { %2228 = vsyncpa [#allocation11], 1 }
 0x753   :  { %2229 = vsyncpa [#allocation14], 1 }
 0x754   :  { %2230 = vsyncpa [#allocation17], 1 }
 0x755   :  { %2231 = vsyncpa [#allocation4], 1 }
 0x756   :  { %2233 = vsyncpa [#allocation4 + $0x1], 1 }
 0x757   :  { %2234 = vsyncpa [#allocation5], 1 }
 0x758   :  { %2236 = vsyncpa [#allocation5 + $0x1], 1 }

</bundles_post_ra>
